<compile_context>
chip_gen: v6e
topology: v6e:2x2x1
jax: 0.10.0
libtpu: 0.0.40
codegen_flags: <defaults>
</compile_context>

<pallas_src>
import jax
import jax.numpy as jnp
from jax.experimental import pallas as pl
from jax.experimental.pallas import tpu as pltpu


def _generator_kernel(noise_ref, types_ref,
                      w1n_ref, w1t_ref, b1_ref,
                      w2_ref, b2_ref,
                      w3_ref, b3_ref,
                      w4_ref, b4_ref,
                      o_ref):
    """One batch tile of the fused 4-layer MLP (bf16 matmuls, f32 accum)."""
    bf16 = jnp.bfloat16

    noise = noise_ref[...].astype(bf16)
    types = types_ref[...].astype(bf16)

    # Layer 1: fused concat -> split matmul.
    h = (jnp.dot(noise, w1n_ref[...], preferred_element_type=jnp.float32)
         + jnp.dot(types, w1t_ref[...], preferred_element_type=jnp.float32)
         + b1_ref[...])
    h = jnp.maximum(h, 0.0)

    # Layer 2
    h = jnp.dot(h.astype(bf16), w2_ref[...],
                preferred_element_type=jnp.float32) + b2_ref[...]
    h = jnp.maximum(h, 0.0)

    # Layer 3
    h = jnp.dot(h.astype(bf16), w3_ref[...],
                preferred_element_type=jnp.float32) + b3_ref[...]
    h = jnp.maximum(h, 0.0)

    # Layer 4 + Tanh
    h = jnp.dot(h.astype(bf16), w4_ref[...],
                preferred_element_type=jnp.float32) + b4_ref[...]
    o_ref[...] = jnp.tanh(h).astype(o_ref.dtype)


def generator_forward(noise, transaction_types, params, *, batch_tile=256):
    """JAX wrapper: pad batch / output lanes, launch batch-tiled fused MLP."""
    f32, bf16 = jnp.float32, jnp.bfloat16

    batch, noise_dim = noise.shape
    type_dim = transaction_types.shape[1]
    out_dim = params["w4"].shape[1]

    # Lane-dense output: pad feature dim to a multiple of 128.
    out_pad = ((out_dim + 127) // 128) * 128

    # Batch tiling: pad batch up to a whole number of MXU-friendly tiles.
    tb = batch_tile
    n_tiles = pl.cdiv(batch, tb)
    padded_batch = n_tiles * tb

    # Weight prep: split W1 for the fused concat, cast weights to bf16,
    # keep biases f32, zero-pad the last layer to the lane-dense width.
    w1 = params["w1"]
    w1n = w1[:noise_dim].astype(bf16)
    w1t = w1[noise_dim:].astype(bf16)
    b1 = params["b1"].astype(f32)
    w2 = params["w2"].astype(bf16)
    b2 = params["b2"].astype(f32)
    w3 = params["w3"].astype(bf16)
    b3 = params["b3"].astype(f32)
    w4 = params["w4"].astype(bf16)
    b4 = params["b4"].astype(f32)
    if out_pad != out_dim:
        w4 = jnp.pad(w4, ((0, 0), (0, out_pad - out_dim)))
        b4 = jnp.pad(b4, ((0, 0), (0, out_pad - out_dim)))

    noise_p = jnp.pad(noise.astype(f32), ((0, padded_batch - batch), (0, 0)))
    types_p = jnp.pad(transaction_types.astype(f32),
                      ((0, padded_batch - batch), (0, 0)))

    def resident(arr):
        nd = arr.ndim
        return pl.BlockSpec(arr.shape, lambda i, _nd=nd: (0,) * _nd)

    in_specs = [
        pl.BlockSpec((tb, noise_dim), lambda i: (i, 0)),   # streamed over batch
        pl.BlockSpec((tb, type_dim), lambda i: (i, 0)),    # streamed over batch
        resident(w1n), resident(w1t), resident(b1),        # VMEM-resident weights
        resident(w2), resident(b2),
        resident(w3), resident(b3),
        resident(w4), resident(b4),
    ]
    out_spec = pl.BlockSpec((tb, out_pad), lambda i: (i, 0))

    out = pl.pallas_call(
        _generator_kernel,
        out_shape=jax.ShapeDtypeStruct((padded_batch, out_pad), f32),
        grid=(n_tiles,),
        in_specs=in_specs,
        out_specs=out_spec,
        compiler_params=pltpu.CompilerParams(
            dimension_semantics=("parallel",),        # shard batch tiles over TCs
            vmem_limit_bytes=32 * 1024 * 1024),       # fits v7x 64 MiB VMEM budget
    )(noise_p, types_p, w1n, w1t, b1, w2, b2, w3, b3, w4, b4)

    return out[:batch, :out_dim]


def init_params(key, noise_dim, transaction_type_dim, output_dim):
    """Deterministic synthetic init (PyTorch-Linear-style uniform bounds)."""
    in_dim = noise_dim + transaction_type_dim
    dims = [(in_dim, 128), (128, 256), (256, 512), (512, output_dim)]
    params = {}
    for i, (fan_in, fan_out) in enumerate(dims, start=1):
        key, kw, kb = jax.random.split(key, 3)
        bound = 1.0 / (fan_in ** 0.5)
        params[f"w{i}"] = jax.random.uniform(
            kw, (fan_in, fan_out), jnp.float32, -bound, bound)
        params[f"b{i}"] = jax.random.uniform(
            kb, (1, fan_out), jnp.float32, -bound, bound)
    return params


def _reference_forward(noise, transaction_types, params):
    """Plain-JAX reference emulating the same bf16-weight / f32-accum math."""
    bf = lambda a: a.astype(jnp.bfloat16)
    noise_dim = noise.shape[1]
    w1 = params["w1"]
    h = (jnp.dot(bf(noise), bf(w1[:noise_dim]),
                 preferred_element_type=jnp.float32)
         + jnp.dot(bf(transaction_types), bf(w1[noise_dim:]),
                   preferred_element_type=jnp.float32)
         + params["b1"])
    h = jnp.maximum(h, 0.0)
    h = jnp.dot(bf(h), bf(params["w2"]),
                preferred_element_type=jnp.float32) + params["b2"]
    h = jnp.maximum(h, 0.0)
    h = jnp.dot(bf(h), bf(params["w3"]),
                preferred_element_type=jnp.float32) + params["b3"]
    h = jnp.maximum(h, 0.0)
    h = jnp.dot(bf(h), bf(params["w4"]),
                preferred_element_type=jnp.float32) + params["b4"]
    return jnp.tanh(h)


if __name__ == "__main__":
    noise_dim = 16
    transaction_type_dim = 4
    output_dim = 32
    batch = 8

    key = jax.random.PRNGKey(0)
    k_params, k_noise, k_type = jax.random.split(key, 3)

    params = init_params(k_params, noise_dim, transaction_type_dim, output_dim)

    noise = jax.random.normal(k_noise, (batch, noise_dim), jnp.float32)
    type_idx = jax.random.randint(k_type, (batch,), 0, transaction_type_dim)
    transaction_types = jax.nn.one_hot(type_idx, transaction_type_dim,
                                       dtype=jnp.float32)

    out = generator_forward(noise, transaction_types, params)
    out = jax.block_until_ready(out)

    ref = _reference_forward(noise, transaction_types, params)

    assert out.shape == (batch, output_dim)
    assert jnp.max(jnp.abs(out - ref)) < 1e-2
    print("KERNEL_OK")
</pallas_src>

<mosaic_0001>
module attributes {stable_mosaic.version = 11 : i64} {
  func.func @_generator_kernel(%arg0: i32, %arg1: memref<256x16xf32, #tpu.memory_space<vmem>>, %arg2: memref<256x4xf32, #tpu.memory_space<vmem>>, %arg3: memref<16x128xbf16, #tpu.memory_space<vmem>>, %arg4: memref<4x128xbf16, #tpu.memory_space<vmem>>, %arg5: memref<1x128xf32, #tpu.memory_space<vmem>>, %arg6: memref<128x256xbf16, #tpu.memory_space<vmem>>, %arg7: memref<1x256xf32, #tpu.memory_space<vmem>>, %arg8: memref<256x512xbf16, #tpu.memory_space<vmem>>, %arg9: memref<1x512xf32, #tpu.memory_space<vmem>>, %arg10: memref<512x128xbf16, #tpu.memory_space<vmem>>, %arg11: memref<1x128xf32, #tpu.memory_space<vmem>>, %arg12: memref<256x128xf32, #tpu.memory_space<vmem>>) attributes {dimension_semantics = [#tpu.dimension_semantics<parallel>], iteration_bounds = array<i64: 1>, scalar_prefetch = 0 : i64, scratch_operands = 0 : i64, tpu.core_type = #tpu.core_type<tc>, window_params = [{transform_indices = @transform_0, window_bounds = array<i64: 256, 16>}, {transform_indices = @transform_1, window_bounds = array<i64: 256, 4>}, {pipeline_mode = #tpu.pipeline_mode<synchronous>, transform_indices = @transform_2, window_bounds = array<i64: 16, 128>}, {pipeline_mode = #tpu.pipeline_mode<synchronous>, transform_indices = @transform_3, window_bounds = array<i64: 4, 128>}, {pipeline_mode = #tpu.pipeline_mode<synchronous>, transform_indices = @transform_4, window_bounds = array<i64: 1, 128>}, {pipeline_mode = #tpu.pipeline_mode<synchronous>, transform_indices = @transform_5, window_bounds = array<i64: 128, 256>}, {pipeline_mode = #tpu.pipeline_mode<synchronous>, transform_indices = @transform_6, window_bounds = array<i64: 1, 256>}, {pipeline_mode = #tpu.pipeline_mode<synchronous>, transform_indices = @transform_7, window_bounds = array<i64: 256, 512>}, {pipeline_mode = #tpu.pipeline_mode<synchronous>, transform_indices = @transform_8, window_bounds = array<i64: 1, 512>}, {pipeline_mode = #tpu.pipeline_mode<synchronous>, transform_indices = @transform_9, window_bounds = array<i64: 512, 128>}, {pipeline_mode = #tpu.pipeline_mode<synchronous>, transform_indices = @transform_10, window_bounds = array<i64: 1, 128>}, {transform_indices = @transform_11, window_bounds = array<i64: 256, 128>}]} {
    %c0 = arith.constant 0 : index
    %c0_0 = arith.constant 0 : index
    %0 = vector.load %arg1[%c0, %c0_0] : memref<256x16xf32, #tpu.memory_space<vmem>>, vector<256x16xf32>
    %1 = arith.truncf %0 : vector<256x16xf32> to vector<256x16xbf16>
    %c0_1 = arith.constant 0 : index
    %c0_2 = arith.constant 0 : index
    %2 = vector.load %arg2[%c0_1, %c0_2] : memref<256x4xf32, #tpu.memory_space<vmem>>, vector<256x4xf32>
    %3 = arith.truncf %2 : vector<256x4xf32> to vector<256x4xbf16>
    %c0_3 = arith.constant 0 : index
    %c0_4 = arith.constant 0 : index
    %4 = vector.load %arg3[%c0_3, %c0_4] : memref<16x128xbf16, #tpu.memory_space<vmem>>, vector<16x128xbf16>
    %cst = arith.constant dense<0.000000e+00> : vector<256x128xf32>
    %5 = tpu.matmul %1, %4, %cst {dimension_numbers = #tpu.dot_dimension_numbers<[1], [0], [0], [1], [0, 0, 1, 1], [], []>} : vector<256x16xbf16>, vector<16x128xbf16>, vector<256x128xf32> -> vector<256x128xf32>
    %c0_5 = arith.constant 0 : index
    %c0_6 = arith.constant 0 : index
    %6 = vector.load %arg4[%c0_5, %c0_6] : memref<4x128xbf16, #tpu.memory_space<vmem>>, vector<4x128xbf16>
    %cst_7 = arith.constant dense<0.000000e+00> : vector<256x128xf32>
    %7 = tpu.matmul %3, %6, %cst_7 {dimension_numbers = #tpu.dot_dimension_numbers<[1], [0], [0], [1], [0, 0, 1, 1], [], []>} : vector<256x4xbf16>, vector<4x128xbf16>, vector<256x128xf32> -> vector<256x128xf32>
    %8 = arith.addf %5, %7 : vector<256x128xf32>
    %c0_8 = arith.constant 0 : index
    %c0_9 = arith.constant 0 : index
    %9 = vector.load %arg5[%c0_8, %c0_9] : memref<1x128xf32, #tpu.memory_space<vmem>>, vector<1x128xf32>
    %10 = vector.broadcast %9 : vector<1x128xf32> to vector<256x128xf32>
    %11 = arith.addf %8, %10 : vector<256x128xf32>
    %cst_10 = arith.constant 0.000000e+00 : f32
    %12 = vector.broadcast %cst_10 : f32 to vector<256x128xf32>
    %13 = arith.maximumf %11, %12 : vector<256x128xf32>
    %14 = arith.truncf %13 : vector<256x128xf32> to vector<256x128xbf16>
    %c0_11 = arith.constant 0 : index
    %c0_12 = arith.constant 0 : index
    %15 = vector.load %arg6[%c0_11, %c0_12] : memref<128x256xbf16, #tpu.memory_space<vmem>>, vector<128x256xbf16>
    %cst_13 = arith.constant dense<0.000000e+00> : vector<256x256xf32>
    %16 = tpu.matmul %14, %15, %cst_13 {dimension_numbers = #tpu.dot_dimension_numbers<[1], [0], [0], [1], [0, 0, 1, 1], [], []>} : vector<256x128xbf16>, vector<128x256xbf16>, vector<256x256xf32> -> vector<256x256xf32>
    %c0_14 = arith.constant 0 : index
    %c0_15 = arith.constant 0 : index
    %17 = vector.load %arg7[%c0_14, %c0_15] : memref<1x256xf32, #tpu.memory_space<vmem>>, vector<1x256xf32>
    %18 = vector.broadcast %17 : vector<1x256xf32> to vector<256x256xf32>
    %19 = arith.addf %16, %18 : vector<256x256xf32>
    %cst_16 = arith.constant 0.000000e+00 : f32
    %20 = vector.broadcast %cst_16 : f32 to vector<256x256xf32>
    %21 = arith.maximumf %19, %20 : vector<256x256xf32>
    %22 = arith.truncf %21 : vector<256x256xf32> to vector<256x256xbf16>
    %c0_17 = arith.constant 0 : index
    %c0_18 = arith.constant 0 : index
    %23 = vector.load %arg8[%c0_17, %c0_18] : memref<256x512xbf16, #tpu.memory_space<vmem>>, vector<256x512xbf16>
    %cst_19 = arith.constant dense<0.000000e+00> : vector<256x512xf32>
    %24 = tpu.matmul %22, %23, %cst_19 {dimension_numbers = #tpu.dot_dimension_numbers<[1], [0], [0], [1], [0, 0, 1, 1], [], []>} : vector<256x256xbf16>, vector<256x512xbf16>, vector<256x512xf32> -> vector<256x512xf32>
    %c0_20 = arith.constant 0 : index
    %c0_21 = arith.constant 0 : index
    %25 = vector.load %arg9[%c0_20, %c0_21] : memref<1x512xf32, #tpu.memory_space<vmem>>, vector<1x512xf32>
    %26 = vector.broadcast %25 : vector<1x512xf32> to vector<256x512xf32>
    %27 = arith.addf %24, %26 : vector<256x512xf32>
    %cst_22 = arith.constant 0.000000e+00 : f32
    %28 = vector.broadcast %cst_22 : f32 to vector<256x512xf32>
    %29 = arith.maximumf %27, %28 : vector<256x512xf32>
    %30 = arith.truncf %29 : vector<256x512xf32> to vector<256x512xbf16>
    %c0_23 = arith.constant 0 : index
    %c0_24 = arith.constant 0 : index
    %31 = vector.load %arg10[%c0_23, %c0_24] : memref<512x128xbf16, #tpu.memory_space<vmem>>, vector<512x128xbf16>
    %cst_25 = arith.constant dense<0.000000e+00> : vector<256x128xf32>
    %32 = tpu.matmul %30, %31, %cst_25 {dimension_numbers = #tpu.dot_dimension_numbers<[1], [0], [0], [1], [0, 0, 1, 1], [], []>} : vector<256x512xbf16>, vector<512x128xbf16>, vector<256x128xf32> -> vector<256x128xf32>
    %c0_26 = arith.constant 0 : index
    %c0_27 = arith.constant 0 : index
    %33 = vector.load %arg11[%c0_26, %c0_27] : memref<1x128xf32, #tpu.memory_space<vmem>>, vector<1x128xf32>
    %34 = vector.broadcast %33 : vector<1x128xf32> to vector<256x128xf32>
    %35 = arith.addf %32, %34 : vector<256x128xf32>
    %36 = math.tanh %35 : vector<256x128xf32>
    %c0_28 = arith.constant 0 : index
    %c0_29 = arith.constant 0 : index
    %37 = vector.load %arg12[%c0_28, %c0_29] : memref<256x128xf32, #tpu.memory_space<vmem>>, vector<256x128xf32>
    tpu.vector_store %arg12[%c0_28, %c0_29], %36 {strides = array<i32>} : memref<256x128xf32, #tpu.memory_space<vmem>>, vector<256x128xf32>,
    return
  }
  func.func @transform_0(%arg0: i32) -> (i32, i32) {
    %c0_i32 = arith.constant 0 : i32
    %c0_i32_0 = arith.constant 0 : i32
    return %arg0, %c0_i32 : i32, i32
  }
  func.func @transform_1(%arg0: i32) -> (i32, i32) {
    %c0_i32 = arith.constant 0 : i32
    %c0_i32_0 = arith.constant 0 : i32
    return %arg0, %c0_i32 : i32, i32
  }
  func.func @transform_2(%arg0: i32) -> (i32, i32) {
    %c0_i32 = arith.constant 0 : i32
    %c0_i32_0 = arith.constant 0 : i32
    %c0_i32_1 = arith.constant 0 : i32
    return %c0_i32, %c0_i32_0 : i32, i32
  }
  func.func @transform_3(%arg0: i32) -> (i32, i32) {
    %c0_i32 = arith.constant 0 : i32
    %c0_i32_0 = arith.constant 0 : i32
    %c0_i32_1 = arith.constant 0 : i32
    return %c0_i32, %c0_i32_0 : i32, i32
  }
  func.func @transform_4(%arg0: i32) -> (i32, i32) {
    %c0_i32 = arith.constant 0 : i32
    %c0_i32_0 = arith.constant 0 : i32
    %c0_i32_1 = arith.constant 0 : i32
    return %c0_i32, %c0_i32_0 : i32, i32
  }
  func.func @transform_5(%arg0: i32) -> (i32, i32) {
    %c0_i32 = arith.constant 0 : i32
    %c0_i32_0 = arith.constant 0 : i32
    %c0_i32_1 = arith.constant 0 : i32
    return %c0_i32, %c0_i32_0 : i32, i32
  }
  func.func @transform_6(%arg0: i32) -> (i32, i32) {
    %c0_i32 = arith.constant 0 : i32
    %c0_i32_0 = arith.constant 0 : i32
    %c0_i32_1 = arith.constant 0 : i32
    return %c0_i32, %c0_i32_0 : i32, i32
  }
  func.func @transform_7(%arg0: i32) -> (i32, i32) {
    %c0_i32 = arith.constant 0 : i32
    %c0_i32_0 = arith.constant 0 : i32
    %c0_i32_1 = arith.constant 0 : i32
    return %c0_i32, %c0_i32_0 : i32, i32
  }
  func.func @transform_8(%arg0: i32) -> (i32, i32) {
    %c0_i32 = arith.constant 0 : i32
    %c0_i32_0 = arith.constant 0 : i32
    %c0_i32_1 = arith.constant 0 : i32
    return %c0_i32, %c0_i32_0 : i32, i32
  }
  func.func @transform_9(%arg0: i32) -> (i32, i32) {
    %c0_i32 = arith.constant 0 : i32
    %c0_i32_0 = arith.constant 0 : i32
    %c0_i32_1 = arith.constant 0 : i32
    return %c0_i32, %c0_i32_0 : i32, i32
  }
  func.func @transform_10(%arg0: i32) -> (i32, i32) {
    %c0_i32 = arith.constant 0 : i32
    %c0_i32_0 = arith.constant 0 : i32
    %c0_i32_1 = arith.constant 0 : i32
    return %c0_i32, %c0_i32_0 : i32, i32
  }
  func.func @transform_11(%arg0: i32) -> (i32, i32) {
    %c0_i32 = arith.constant 0 : i32
    %c0_i32_0 = arith.constant 0 : i32
    return %arg0, %c0_i32 : i32, i32
  }
}

</mosaic_0001>

<bundles_post_ra>
// kernel: tpu_custom_call.1
= control target key start
LH: loop header
LB: loop body
LE: loop exit
PB: predicated region body
PF: predicated region fallthrough
CT: control target
= control target key end

     0   :  { %16 = vsyncpa [#allocation3], 0  ;;  %s4434_s0 = inlined_call_operand.vmem [shape: f32[256,16], index: 0, kind: input, shape index: {}]   ;;  %s4435_s1 = inlined_call_operand.vmem [shape: f32[256,4], index: 1, kind: input, shape index: {}]   ;;  %s4436_s2 = inlined_call_operand.vmem [shape: bf16[16,128], index: 2, kind: input, shape index: {}]   ;;  %s4437_s3 = inlined_call_operand.vmem [shape: bf16[4,128], index: 3, kind: input, shape index: {}]   ;;  %s4438_s4 = inlined_call_operand.vmem [shape: f32[1,128], index: 4, kind: input, shape index: {}]   ;;  %s4439_s5 = inlined_call_operand.hbm [shape: bf16[128,256], index: 5, kind: input, shape index: {}]   ;;  %s4440_s6 = inlined_call_operand.vmem [shape: f32[1,256], index: 6, kind: input, shape index: {}]   ;;  %s4441_s7 = inlined_call_operand.vmem [shape: bf16[256,512], index: 7, kind: input, shape index: {}]   ;;  %s4442_s8 = inlined_call_operand.vmem [shape: f32[1,512], index: 8, kind: input, shape index: {}]   ;;  %s4443_s9 = inlined_call_operand.hbm [shape: bf16[512,128], index: 9, kind: input, shape index: {}]   ;;  %s4444_s10 = inlined_call_operand.vmem [shape: f32[1,128], index: 10, kind: input, shape index: {}]   ;;  %s4445_s11 = inlined_call_operand.hbm [shape: f32[256,128], index: 11, kind: output, shape index: {}]  }
   0x1   :  { %17 = vsyncpa [#allocation6], 0 }
   0x2   :  { %18 = vsyncpa [#allocation4], 0  ;;  %s3513_s17 = smov [#allocation2]  }
   0x3   :  { %s34_s18 = sshll.u32 %s3513_s17, 4  ;;  %s35_s18 = int_to_ptr.vmem [resolvable:$true] %s34_s18 }
   0x4   :  { %s3455_s19 = scalar_lea.vmem %s35_s18, 2048  ;;  %p3460_p1 = scmp.lt.s32.totalorder %s35_s18, %s35_s18 }
   0x5   :  { %p3456_p0 = scmp.ne.s32.totalorder %s35_s18, %s3455_s19  ;;  %p3461_p2 = scmp.lt.s32.totalorder %s3455_s19, %s3455_s19 }
   0x7   :  { %p3462_p3 = por %p3461_p2, %p3460_p1 }
   0x9   :  { %p3463_p4 = pnand %p3462_p3, %p3456_p0 }
   0xb   :  { %3466 = shalt.err (!%p3463_p4)
}
   0xc   :  { %s3514_s20 = smov 128   ;;  %s3515_s21 = smov 8  }
   0xd   :  { %40 = dma.hbm_to_vmem [thread:$0]  %s4439_s5, 2048, %s35_s18, [#allocation3], %s3514_s20, %s3514_s20, %s3515_s21  }
   0xe   :  { %s3516_s24 = smov [#allocation5]  }
   0xf   :  { %s52_s25 = sshll.u32 %s3516_s24, 4  ;;  %s53_s25 = int_to_ptr.vmem [resolvable:$true] %s52_s25 }
  0x10   :  { %s3475_s26 = scalar_lea.vmem %s53_s25, 4096  ;;  %p3480_p6 = scmp.lt.s32.totalorder %s53_s25, %s53_s25 }
  0x11   :  { %p3476_p5 = scmp.ne.s32.totalorder %s53_s25, %s3475_s26  ;;  %p3481_p7 = scmp.lt.s32.totalorder %s3475_s26, %s3475_s26 }
  0x13   :  { %p3482_p8 = por %p3481_p7, %p3480_p6 }
  0x15   :  { %p3483_p9 = pnand %p3482_p8, %p3476_p5 }
  0x17   :  { %3486 = shalt.err (!%p3483_p9)
}
  0x18   :  { %s3517_s27 = smov 64   ;;  %s3518_s28 = smov 4  }
  0x19   :  { %58 = dma.hbm_to_vmem [thread:$0]  %s4443_s9, 4096, %s53_s25, [#allocation6], %s3517_s27, %s3517_s27, %s3518_s28  }
  0x1a   :  { %3507 = dma.done.wait [#allocation3], 2048  }
  0x1b   :  { %3508 = vsyncadd [#allocation3], 4294965248 }
  0x1c   :  { %3509 = dma.done.wait [#allocation6], 4096  }
  0x1d   :  { %3510 = vsyncadd [#allocation6], 4294963200  ;;  %vm216_vm0 = vcmask 1041408   ;;  %v166_v0 = vld [vmem:[%s4437_s3] sm:$0x3]  ;;  %v117_v4 = vld [vmem:[%s4435_s1 + $0x8] sm:$0xff] }
  0x1e   :  { %3221 = vmatprep.subr.msk.bf16.mxu0 %vm216_vm0, %v166_v0  ;;  %v218_v1 = vsel %vm216_vm0, %v166_v0, 0  ;;  %v3230_v2 = vld [vmem:[%s4436_s2] sm:$0xff]   ;;  %vm167_vm1 = vcmask 31744   ;;  %v118_v6 = vld [vmem:[%s4435_s1 + $0x10] sm:$0xff]  ;;  %v119_v7 = vld [vmem:[%s4435_s1 + $0x18] sm:$0xff]  ;;  %vm387_vm2 = vcmask 130048  }
  0x1f   :  { %v116_v3 = vld [vmem:[%s4435_s1] sm:$0xff]  ;;  %3138 = vmatpush3.bf16.msra.mxu0 %v218_v1  ;;  %3171 = vmatprep.subr.bf16.mxu1 %v3230_v2  ;;  %v149_v9 = vpack.c.bf16 %v119_v7, %v118_v6  ;;  %v69_v10 = vld [vmem:[%s4434_s0 + $0x8] sm:$0xff]  ;;  %v70_v11 = vld [vmem:[%s4434_s0 + $0x10] sm:$0xff] }
  0x20   :  { %v148_v5 = vpack.c.bf16 %v117_v4, %v116_v3  ;;  %v68_v8 = vld [vmem:[%s4434_s0] sm:$0xff]  ;;  %v71_v12 = vld [vmem:[%s4434_s0 + $0x18] sm:$0xff]  ;;  %3172 = vmatpush3.bf16.msra.mxu1 %v3230_v2  ;;  %v121_v16 = vld [vmem:[%s4435_s1 + $0x28] sm:$0xff] }
  0x21   :  { %v100_v13 = vpack.c.bf16 %v69_v10, %v68_v8  ;;  %v101_v14 = vpack.c.bf16 %v71_v12, %v70_v11  ;;  %v120_v15 = vld [vmem:[%s4435_s1 + $0x20] sm:$0xff]  ;;  %v73_v19 = vld [vmem:[%s4434_s0 + $0x28] sm:$0xff]  ;;  %v122_v21 = vld [vmem:[%s4435_s1 + $0x30] sm:$0xff] }
  0x22   :  { %3139 = vmatprep.mubr.msk.bf16.mxu0 %vm167_vm1, %v148_v5  ;;  %v72_v17 = vld [vmem:[%s4434_s0 + $0x20] sm:$0xff]  ;;  %v150_v18 = vpack.c.bf16 %v121_v16, %v120_v15  ;;  %v123_v22 = vld [vmem:[%s4435_s1 + $0x38] sm:$0xff]  ;;  %v125_v24 = vld [vmem:[%s4435_s1 + $0x48] sm:$0xff] }
  0x23   :  { %3140 = vmatmul.mubr.msk.bf16.vlgmr.msra.gmra.mxu0 %vm167_vm1, %v149_v9  ;;  %3173 = vmatprep.mubr.msk.bf16.mxu1 %vm387_vm2, %v100_v13  ;;  %v102_v20 = vpack.c.bf16 %v73_v19, %v72_v17  ;;  %v124_v23 = vld [vmem:[%s4435_s1 + $0x40] sm:$0xff]  ;;  %v74_v25 = vld [vmem:[%s4434_s0 + $0x30] sm:$0xff]  ;;  %v75_v26 = vld [vmem:[%s4434_s0 + $0x38] sm:$0xff]  ;;  %v151_v27 = vpack.c.bf16 %v123_v22, %v122_v21 }
  0x24   :  { %3174 = vmatmul.mubr.msk.bf16.vlgmr.msra.gmra.mxu1 %vm387_vm2, %v101_v14  ;;  %3143 = vmatprep.mubr.msk.bf16.mxu0 %vm167_vm1, %v150_v18  ;;  %v76_v28 = vld [vmem:[%s4434_s0 + $0x40] sm:$0xff]  ;;  %v77_v29 = vld [vmem:[%s4434_s0 + $0x48] sm:$0xff]  ;;  %v152_v30 = vpack.c.bf16 %v125_v24, %v124_v23  ;;  %v103_v31 = vpack.c.bf16 %v75_v26, %v74_v25  ;;  %v126_v33 = vld [vmem:[%s4435_s1 + $0x50] sm:$0xff] }
  0x25   :  { %3177 = vmatprep.mubr.msk.bf16.mxu1 %vm387_vm2, %v102_v20  ;;  %v104_v32 = vpack.c.bf16 %v77_v29, %v76_v28  ;;  %v127_v34 = vld [vmem:[%s4435_s1 + $0x58] sm:$0xff]  ;;  %v128_v35 = vld [vmem:[%s4435_s1 + $0x60] sm:$0xff]  ;;  %v129_v36 = vld [vmem:[%s4435_s1 + $0x68] sm:$0xff] }
  0x26   :  { %v78_v37 = vld [vmem:[%s4434_s0 + $0x50] sm:$0xff]  ;;  %v79_v38 = vld [vmem:[%s4434_s0 + $0x58] sm:$0xff]  ;;  %v153_v39 = vpack.c.bf16 %v127_v34, %v126_v33  ;;  %v80_v40 = vld [vmem:[%s4434_s0 + $0x60] sm:$0xff]  ;;  %v154_v42 = vpack.c.bf16 %v129_v36, %v128_v35 }
  0x27   :  { %v81_v41 = vld [vmem:[%s4434_s0 + $0x68] sm:$0xff]  ;;  %v105_v43 = vpack.c.bf16 %v79_v38, %v78_v37  ;;  %v130_v45 = vld [vmem:[%s4435_s1 + $0x70] sm:$0xff]  ;;  %v131_v46 = vld [vmem:[%s4435_s1 + $0x78] sm:$0xff] }
  0x28   :  { %v106_v44 = vpack.c.bf16 %v81_v41, %v80_v40  ;;  %v82_v47 = vld [vmem:[%s4434_s0 + $0x70] sm:$0xff]  ;;  %v83_v48 = vld [vmem:[%s4434_s0 + $0x78] sm:$0xff]  ;;  %v132_v49 = vld [vmem:[%s4435_s1 + $0x80] sm:$0xff]  ;;  %v155_v55 = vpack.c.bf16 %v131_v46, %v130_v45 }
  0x29   :  { %v133_v50 = vld [vmem:[%s4435_s1 + $0x88] sm:$0xff]  ;;  %v84_v51 = vld [vmem:[%s4434_s0 + $0x80] sm:$0xff]  ;;  %v3231_v52 = vld [vmem:[#allocation2 + $0x70] ss:$8 sps:$4 sm:$0xff]   ;;  %v107_v59 = vpack.c.bf16 %v83_v48, %v82_v47 }
  0x2a   :  { %v3233_v53 = vld [vmem:[#allocation2 + $0x74] ss:$8 sps:$4 sm:$0xff]   ;;  %v85_v54 = vld [vmem:[%s4434_s0 + $0x88] sm:$0xff]  ;;  %v156_v57 = vpack.c.bf16 %v133_v50, %v132_v49  ;;  %v136_v0 = vld [vmem:[%s4435_s1 + $0xa0] sm:$0xff] }
  0x2b   :  { %3144 = vmatmul.mubr.msk.bf16.gmra.mxu0 %vm167_vm1, %v151_v27  ;;  %792 = vmatprep.subr.bf16.mxu0 %v3233_v53  ;;  %v3236_v56 = vld [vmem:[#allocation2 + $0x64] ss:$8 sps:$4 sm:$0xff]   ;;  %v3234_v58 = vld [vmem:[#allocation2 + $0x60] ss:$8 sps:$4 sm:$0xff]   ;;  %v3239_v60 = vld [vmem:[#allocation2 + $0x54] ss:$8 sps:$4 sm:$0xff]   ;;  %v108_v61 = vpack.c.bf16 %v85_v54, %v84_v51 }
  0x2c   :  { %3147 = vmatprep.mubr.msk.bf16.mxu0 %vm167_vm1, %v152_v30  ;;  %3178 = vmatmul.mubr.msk.bf16.gmra.mxu1 %vm387_vm2, %v103_v31  ;;  %v134_v62 = vld [vmem:[%s4435_s1 + $0x90] sm:$0xff]  ;;  %v135_v63 = vld [vmem:[%s4435_s1 + $0x98] sm:$0xff]  ;;  %v137_v1 = vld [vmem:[%s4435_s1 + $0xa8] sm:$0xff]  ;;  %v3519_v51 = vmov 0  }
  0x2d   :  { %3181 = vmatprep.mubr.msk.bf16.mxu1 %vm387_vm2, %v104_v32  ;;  %3205 = vmatprep.subr.bf16.mxu1 %v3233_v53  ;;  %v86_v2 = vld [vmem:[%s4434_s0 + $0x90] sm:$0xff]  ;;  %v87_v3 = vld [vmem:[%s4434_s0 + $0x98] sm:$0xff]  ;;  %v3242_v5 = vld [vmem:[#allocation2 + $0x44] ss:$8 sps:$4 sm:$0xff]   ;;  %v157_v9 = vpack.c.bf16 %v135_v63, %v134_v62  ;;  %v158_v11 = vpack.c.bf16 %v137_v1, %v136_v0 }
  0x2e   :  { %793 = vmatpush1.bf16.msra.mxu0 %v3231_v52  ;;  %3213 = vmatpush1.bf16.msra.mxu1 %v3231_v52  ;;  %v3237_v4 = vld [vmem:[#allocation2 + $0x50] ss:$8 sps:$4 sm:$0xff]   ;;  %v88_v6 = vld [vmem:[%s4434_s0 + $0xa0] sm:$0xff]  ;;  %v89_v7 = vld [vmem:[%s4434_s0 + $0xa8] sm:$0xff]  ;;  %v109_v12 = vpack.c.bf16 %v87_v3, %v86_v2 }
  0x2f   :  { %794 = vmatprep.subr.bf16.mxu0 %v3236_v56  ;;  %3206 = vmatprep.subr.bf16.mxu1 %v3236_v56  ;;  %v3240_v8 = vld [vmem:[#allocation2 + $0x40] ss:$8 sps:$4 sm:$0xff]   ;;  %v3245_v10 = vld [vmem:[#allocation2 + $0x34] ss:$8 sps:$4 sm:$0xff]   ;;  %v110_v13 = vpack.c.bf16 %v89_v7, %v88_v6  ;;  %v3243_v16 = vld [vmem:[#allocation2 + $0x30] ss:$8 sps:$4 sm:$0xff]  }
  0x30   :  { %v138_v14 = vld [vmem:[%s4435_s1 + $0xb0] sm:$0xff]  ;;  %v139_v15 = vld [vmem:[%s4435_s1 + $0xb8] sm:$0xff]  ;;  %v140_v17 = vld [vmem:[%s4435_s1 + $0xc0] sm:$0xff] }
  0x31   :  { %v141_v18 = vld [vmem:[%s4435_s1 + $0xc8] sm:$0xff]  ;;  %v90_v20 = vld [vmem:[%s4434_s0 + $0xb0] sm:$0xff]  ;;  %v91_v21 = vld [vmem:[%s4434_s0 + $0xb8] sm:$0xff]  ;;  %v159_v25 = vpack.c.bf16 %v139_v15, %v138_v14 }
  0x32   :  { %795 = vmatpush1.bf16.msra.mxu0 %v3234_v58  ;;  %3214 = vmatpush1.bf16.msra.mxu1 %v3234_v58  ;;  %v3248_v19 = vld [vmem:[#allocation2 + $0x24] ss:$8 sps:$4 sm:$0xff]   ;;  %v3246_v24 = vld [vmem:[#allocation2 + $0x20] ss:$8 sps:$4 sm:$0xff]   ;;  %v160_v26 = vpack.c.bf16 %v141_v18, %v140_v17  ;;  %v111_v27 = vpack.c.bf16 %v91_v21, %v90_v20  ;;  %v142_v29 = vld [vmem:[%s4435_s1 + $0xd0] sm:$0xff] }
  0x33   :  { %3148 = vmatmul.mubr.msk.bf16.gmra.mxu0 %vm167_vm1, %v153_v39  ;;  %796 = vmatprep.subr.bf16.mxu0 %v3239_v60  ;;  %v92_v22 = vld [vmem:[%s4434_s0 + $0xc0] sm:$0xff]  ;;  %v93_v23 = vld [vmem:[%s4434_s0 + $0xc8] sm:$0xff]  ;;  %v143_v30 = vld [vmem:[%s4435_s1 + $0xd8] sm:$0xff] }
  0x34   :  { %3151 = vmatprep.mubr.msk.bf16.mxu0 %vm167_vm1, %v154_v42  ;;  %3182 = vmatmul.mubr.msk.bf16.gmra.mxu1 %vm387_vm2, %v105_v43  ;;  %v112_v28 = vpack.c.bf16 %v93_v23, %v92_v22  ;;  %v144_v31 = vld [vmem:[%s4435_s1 + $0xe0] sm:$0xff]  ;;  %v145_v32 = vld [vmem:[%s4435_s1 + $0xe8] sm:$0xff]  ;;  %v94_v33 = vld [vmem:[%s4434_s0 + $0xd0] sm:$0xff]  ;;  %v161_v37 = vpack.c.bf16 %v143_v30, %v142_v29 }
  0x35   :  { %3185 = vmatprep.mubr.msk.bf16.mxu1 %vm387_vm2, %v106_v44  ;;  %3207 = vmatprep.subr.bf16.mxu1 %v3239_v60  ;;  %v95_v34 = vld [vmem:[%s4434_s0 + $0xd8] sm:$0xff]  ;;  %v96_v35 = vld [vmem:[%s4434_s0 + $0xe0] sm:$0xff]  ;;  %v97_v36 = vld [vmem:[%s4434_s0 + $0xe8] sm:$0xff]  ;;  %v162_v38 = vpack.c.bf16 %v145_v32, %v144_v31 }
  0x36   :  { %797 = vmatpush1.bf16.msra.mxu0 %v3237_v4  ;;  %3215 = vmatpush1.bf16.msra.mxu1 %v3237_v4  ;;  %v113_v39 = vpack.c.bf16 %v95_v34, %v94_v33  ;;  %v114_v40 = vpack.c.bf16 %v97_v36, %v96_v35  ;;  %v146_v41 = vld [vmem:[%s4435_s1 + $0xf0] sm:$0xff]  ;;  %v147_v42 = vld [vmem:[%s4435_s1 + $0xf8] sm:$0xff]  ;;  %v3254_v49 = vld [vmem:[#allocation2 + $0x4] ss:$8 sps:$4 sm:$0xff]  }
  0x37   :  { %798 = vmatprep.subr.bf16.mxu0 %v3242_v5  ;;  %3208 = vmatprep.subr.bf16.mxu1 %v3242_v5  ;;  %v98_v43 = vld [vmem:[%s4434_s0 + $0xf0] sm:$0xff]  ;;  %v99_v44 = vld [vmem:[%s4434_s0 + $0xf8] sm:$0xff]  ;;  %v163_v45 = vpack.c.bf16 %v147_v42, %v146_v41  ;;  %v3252_v50 = vld [vmem:[#allocation2] ss:$8 sps:$4 sm:$0xff]  }
  0x38   :  { %v115_v46 = vpack.c.bf16 %v99_v44, %v98_v43  ;;  %v3249_v47 = vld [vmem:[#allocation2 + $0x10] ss:$8 sps:$4 sm:$0xff]   ;;  %v3251_v48 = vld [vmem:[#allocation2 + $0x14] ss:$8 sps:$4 sm:$0xff]   ;;  %v3831_v62 = vld [vmem:[%s4438_s4] ss:$0 sm:$0xff] }
  0x39   :  { %v3257_v52 = vld [vmem:[%s4441_s7 + $0xe4] ss:$16 sps:$4 sm:$0xff]   ;;  %v3260_v53 = vld [vmem:[%s4441_s7 + $0xec] ss:$16 sps:$4 sm:$0xff]   ;;  %v3258_v14 = vld [vmem:[%s4441_s7 + $0xe8] ss:$16 sps:$4 sm:$0xff]  }
  0x3a   :  { %799 = vmatpush1.bf16.msra.mxu0 %v3240_v8  ;;  %3216 = vmatpush1.bf16.msra.mxu1 %v3240_v8  ;;  %v3266_v17 = vld [vmem:[%s4441_s7 + $0xcc] ss:$16 sps:$4 sm:$0xff]   ;;  %v3264_v23 = vld [vmem:[%s4441_s7 + $0xc8] ss:$16 sps:$4 sm:$0xff]  }
  0x3b   :  { %3152 = vmatmul.mubr.msk.bf16.gmra.mxu0 %vm167_vm1, %v155_v55  ;;  %800 = vmatprep.subr.bf16.mxu0 %v3245_v10  ;;  %v3270_v33 = vld [vmem:[%s4441_s7 + $0xa8] ss:$16 sps:$4 sm:$0xff]  }
  0x3c   :  { %3155 = vmatprep.mubr.msk.bf16.mxu0 %vm167_vm1, %v156_v57  ;;  %3186 = vmatmul.mubr.msk.bf16.gmra.mxu1 %vm387_vm2, %v107_v59  ;;  %v3276_v42 = vld [vmem:[%s4441_s7 + $0x88] ss:$16 sps:$4 sm:$0xff]  }
  0x3d   :  { %3189 = vmatprep.mubr.msk.bf16.mxu1 %vm387_vm2, %v108_v61  ;;  %3209 = vmatprep.subr.bf16.mxu1 %v3245_v10 }
  0x3e   :  { %801 = vmatpush1.bf16.msra.mxu0 %v3243_v16  ;;  %3217 = vmatpush1.bf16.msra.mxu1 %v3243_v16 }
  0x3f   :  { %802 = vmatprep.subr.bf16.mxu0 %v3248_v19  ;;  %3210 = vmatprep.subr.bf16.mxu1 %v3248_v19 }
  0x42   :  { %803 = vmatpush1.bf16.msra.mxu0 %v3246_v24  ;;  %3218 = vmatpush1.bf16.msra.mxu1 %v3246_v24 }
  0x43   :  { %3156 = vmatmul.mubr.msk.bf16.gmra.mxu0 %vm167_vm1, %v157_v9  ;;  %804 = vmatprep.subr.bf16.mxu0 %v3251_v48 }
  0x44   :  { %3159 = vmatprep.mubr.msk.bf16.mxu0 %vm167_vm1, %v158_v11  ;;  %3190 = vmatmul.mubr.msk.bf16.gmra.mxu1 %vm387_vm2, %v109_v12 }
  0x45   :  { %3193 = vmatprep.mubr.msk.bf16.mxu1 %vm387_vm2, %v110_v13  ;;  %3211 = vmatprep.subr.bf16.mxu1 %v3251_v48 }
  0x46   :  { %805 = vmatpush1.bf16.msra.mxu0 %v3249_v47  ;;  %3219 = vmatpush1.bf16.msra.mxu1 %v3249_v47  ;;  %v3284_v47 = vld [vmem:[%s4441_s7 + $0x6c] ss:$16 sps:$4 sm:$0xff]  }
  0x47   :  { %806 = vmatprep.subr.bf16.mxu0 %v3254_v49  ;;  %3212 = vmatprep.subr.bf16.mxu1 %v3254_v49 }
  0x4a   :  { %807 = vmatpush1.bf16.msra.mxu0 %v3252_v50  ;;  %3220 = vmatpush1.bf16.msra.mxu1 %v3252_v50 }
  0x4b   :  { %3160 = vmatmul.mubr.msk.bf16.gmra.mxu0 %vm167_vm1, %v159_v25  ;;  %1487 = vmatprep.subr.bf16.mxu1 %v3257_v52 }
  0x4c   :  { %3163 = vmatprep.mubr.msk.bf16.mxu0 %vm167_vm1, %v160_v26  ;;  %3194 = vmatmul.mubr.msk.bf16.gmra.mxu1 %vm387_vm2, %v111_v27  ;;  %v3272_v27 = vld [vmem:[%s4441_s7 + $0xac] ss:$16 sps:$4 sm:$0xff]  }
  0x4d   :  { %3197 = vmatprep.mubr.msk.bf16.mxu1 %vm387_vm2, %v112_v28  ;;  %1680 = vmatprep.subr.bf16.mxu0 %v3260_v53  ;;  %v3282_v53 = vld [vmem:[%s4441_s7 + $0x68] ss:$16 sps:$4 sm:$0xff]  }
  0x53   :  { %3164 = vmatmul.mubr.msk.bf16.gmra.mxu0 %vm167_vm1, %v161_v37  ;;  %v3278_v37 = vld [vmem:[%s4441_s7 + $0x8c] ss:$16 sps:$4 sm:$0xff]  }
  0x54   :  { %3167 = vmatprep.mubr.msk.bf16.mxu0 %vm167_vm1, %v162_v38  ;;  %3198 = vmatmul.mubr.msk.bf16.gmra.mxu1 %vm387_vm2, %v113_v39 }
  0x55   :  { %3201 = vmatprep.mubr.msk.bf16.mxu1 %vm387_vm2, %v114_v40 }
  0x5b   :  { %3168 = vmatmul.mubr.msk.bf16.gmra.mxu0 %vm167_vm1, %v163_v45 }
  0x5c   :  { %3202 = vmatmul.mubr.msk.bf16.gmra.mxu1 %vm387_vm2, %v115_v46  ;;  %824 = vmatprep.mubr.bf16.mxu0 %v3519_v51 }
  0x5d   :  { %904 = vmatprep.mubr.bf16.mxu1 %v3519_v51 }
  0xe3   :  { %v3141_v54 = vpop.f32.mrf.mxu0 }
  0xe4   :  { %v3175_v56 = vpop.f32.mrf.mxu1 }
  0xe5   :  { %v254_v55 = vpop.f32.mrf.mxu0  ;;  %v479_v9 = vadd.f32 %v3175_v56, %v3141_v54 }
  0xe6   :  { %v470_v58 = vpop.f32.mrf.mxu1 }
  0xe7   :  { %v3142_v57 = vpop.f32.mrf.mxu0  ;;  %v471_v59 = vadd.f32 %v470_v58, %v254_v55  ;;  %v606_v20 = vadd.f32 %v3831_v62, %v479_v9 }
  0xe8   :  { %v3176_v61 = vpop.f32.mrf.mxu1 }
  0xe9   :  { %v257_v60 = vpop.f32.mrf.mxu0  ;;  %v604_v1 = vadd.f32 %v3831_v62, %v471_v59  ;;  %v482_v5 = vadd.f32 %v3176_v61, %v3142_v57  ;;  %v638_v30 = vmax.f32 %v606_v20, 0.0  ;;  %v3290_v57 = vld [vmem:[%s4441_s7 + $0x4c] ss:$16 sps:$4 sm:$0xff]  }
  0xea   :  { %v473_v63 = vpop.f32.mrf.mxu1 }
  0xeb   :  { %v3145_v0 = vpop.f32.mrf.mxu0  ;;  %v474_v2 = vadd.f32 %v473_v63, %v257_v60  ;;  %v636_v10 = vmax.f32 %v604_v1, 0.0  ;;  %v607_v15 = vadd.f32 %v3831_v62, %v482_v5  ;;  %v3288_v63 = vld [vmem:[%s4441_s7 + $0x48] ss:$16 sps:$4 sm:$0xff]  }
  0xec   :  { %v3179_v3 = vpop.f32.mrf.mxu1 }
  0xed   :  { %v270_v4 = vpop.f32.mrf.mxu0  ;;  %v605_v6 = vadd.f32 %v3831_v62, %v474_v2  ;;  %v639_v24 = vmax.f32 %v607_v15, 0.0  ;;  %v495_v43 = vadd.f32 %v3179_v3, %v3145_v0  ;;  %v3302_v15 = vld [vmem:[%s4441_s7 + $0xc] ss:$16 sps:$4 sm:$0xff]  }
  0xee   :  { %v486_v7 = vpop.f32.mrf.mxu1 }
  0xef   :  { %v3146_v8 = vpop.f32.mrf.mxu0  ;;  %v637_v11 = vmax.f32 %v605_v6, 0.0  ;;  %v487_v25 = vadd.f32 %v486_v7, %v270_v4  ;;  %v669_v36 = vpack.c.bf16 %v639_v24, %v638_v30  ;;  %v610_v54 = vadd.f32 %v3831_v62, %v495_v43  ;;  %v3296_v4 = vld [vmem:[%s4441_s7 + $0x2c] ss:$16 sps:$4 sm:$0xff]  }
  0xf0   :  { %v3180_v12 = vpop.f32.mrf.mxu1 }
  0xf1   :  { %v273_v13 = vpop.f32.mrf.mxu0  ;;  %v668_v16 = vpack.c.bf16 %v637_v11, %v636_v10  ;;  %v608_v34 = vadd.f32 %v3831_v62, %v487_v25  ;;  %v498_v45 = vadd.f32 %v3180_v12, %v3146_v8  ;;  %v642_v0 = vmax.f32 %v610_v54, 0.0  ;;  %v3294_v10 = vld [vmem:[%s4441_s7 + $0x28] ss:$16 sps:$4 sm:$0xff]   ;;  %v3314_v54 = vld [vmem:[%s4441_s7 + $0x1cc] ss:$16 sps:$4 sm:$0xff]  }
  0xf2   :  { %v489_v18 = vpop.f32.mrf.mxu1 }
  0xf3   :  { %v3842_v19 = vpop.f32.mrf.mxu0  ;;  %825 = vmatmul.mubr.bf16.vlgmr.msra.gmra.mxu0 %v668_v16  ;;  %v490_v26 = vadd.f32 %v489_v18, %v273_v13  ;;  %v640_v44 = vmax.f32 %v608_v34, 0.0  ;;  %v611_v55 = vadd.f32 %v3831_v62, %v498_v45  ;;  %v3255_v45 = vld [vmem:[%s4441_s7 + $0xe0] ss:$16 sps:$4 sm:$0xff]  }
  0xf4   :  { %834 = vmatprep.mubr.bf16.mxu0 %v3519_v51  ;;  %v3846_v21 = vpop.f32.mrf.mxu1  ;;  %1681 = vmatpush1.bf16.msra.mxu0 %v3258_v14 }
  0xf5   :  { %v286_v22 = vpop.f32.mrf.mxu0  ;;  %1682 = vmatprep.subr.bf16.mxu0 %v3266_v17  ;;  %v609_v35 = vadd.f32 %v3831_v62, %v490_v26  ;;  %v643_v1 = vmax.f32 %v611_v55, 0.0 }
  0xf6   :  { %v502_v28 = vpop.f32.mrf.mxu1 }
  0xf7   :  { %v3854_v29 = vpop.f32.mrf.mxu0  ;;  %v641_v46 = vmax.f32 %v609_v35, 0.0  ;;  %v503_v2 = vadd.f32 %v502_v28, %v286_v22  ;;  %v671_v13 = vpack.c.bf16 %v643_v1, %v642_v0 }
  0xf8   :  { %v3856_v31 = vpop.f32.mrf.mxu1  ;;  %1683 = vmatpush1.bf16.msra.mxu0 %v3264_v23  ;;  %v511_v23 = vadd.f32 %v3846_v21, %v3842_v19  ;;  %v3308_v19 = vld [vmem:[%s4441_s7 + $0x1ec] ss:$16 sps:$4 sm:$0xff]  }
  0xf9   :  { %v289_v32 = vpop.f32.mrf.mxu0  ;;  %1684 = vmatprep.subr.bf16.mxu0 %v3272_v27  ;;  %v670_v56 = vpack.c.bf16 %v641_v46, %v640_v44  ;;  %v612_v11 = vadd.f32 %v3831_v62, %v503_v2  ;;  %v514_v24 = vadd.f32 %v3856_v31, %v3854_v29  ;;  %v3300_v27 = vld [vmem:[%s4441_s7 + $0x8] ss:$16 sps:$4 sm:$0xff]  }
  0xfa   :  { %v505_v38 = vpop.f32.mrf.mxu1  ;;  %v3306_v46 = vld [vmem:[%s4441_s7 + $0x1e8] ss:$16 sps:$4 sm:$0xff]  }
  0xfb   :  { %v3866_v39 = vpop.f32.mrf.mxu0  ;;  %835 = vmatmul.mubr.bf16.gmra.mxu0 %v669_v36  ;;  %v506_v3 = vadd.f32 %v505_v38, %v289_v32  ;;  %v644_v28 = vmax.f32 %v612_v11, 0.0  ;;  %v614_v38 = vadd.f32 %v3831_v62, %v511_v23  ;;  %v3267_v11 = vld [vmem:[%s4441_s7 + $0xa0] ss:$16 sps:$4 sm:$0xff]  }
  0xfc   :  { %844 = vmatprep.mubr.bf16.mxu0 %v3519_v51  ;;  %v3869_v40 = vpop.f32.mrf.mxu1  ;;  %1685 = vmatpush1.bf16.msra.mxu0 %v3270_v33 }
  0xfd   :  { %v3871_v41 = vpop.f32.mrf.mxu0  ;;  %1686 = vmatprep.subr.bf16.mxu0 %v3278_v37  ;;  %v613_v12 = vadd.f32 %v3831_v62, %v506_v3  ;;  %v3261_v3 = vld [vmem:[%s4441_s7 + $0xc0] ss:$16 sps:$4 sm:$0xff]  }
  0xfe   :  { %v3879_v48 = vpop.f32.mrf.mxu1 }
  0xff   :  { %v3881_v49 = vpop.f32.mrf.mxu0  ;;  %v645_v30 = vmax.f32 %v613_v12, 0.0  ;;  %v519_v1 = vadd.f32 %v3879_v48, %v3871_v41  ;;  %v3320_v41 = vld [vmem:[%s4441_s7 + $0x1ac] ss:$16 sps:$4 sm:$0xff]   ;;  %v3318_v12 = vld [vmem:[%s4441_s7 + $0x1a8] ss:$16 sps:$4 sm:$0xff]  }
 0x100   :  { %v3883_v50 = vpop.f32.mrf.mxu1  ;;  %1687 = vmatpush1.bf16.msra.mxu0 %v3276_v42  ;;  %v615_v42 = vadd.f32 %v3831_v62, %v514_v24  ;;  %v527_v24 = vadd.f32 %v3869_v40, %v3866_v39  ;;  %v3281_v39 = vld [vmem:[%s4441_s7 + $0x64] ss:$16 sps:$4 sm:$0xff]   ;;  %v3332_v40 = vld [vmem:[%s4441_s7 + $0x16c] ss:$16 sps:$4 sm:$0xff]  }
 0x101   :  { %v3885_v52 = vpop.f32.mrf.mxu0  ;;  %1688 = vmatprep.subr.bf16.mxu0 %v3284_v47  ;;  %v672_v43 = vpack.c.bf16 %v645_v30, %v644_v28 }
 0x102   :  { %v3895_v58 = vpop.f32.mrf.mxu1  ;;  %v647_v0 = vmax.f32 %v615_v42, 0.0 }
 0x103   :  { %v3157_v59 = vpop.f32.mrf.mxu0  ;;  %845 = vmatmul.mubr.bf16.gmra.mxu0 %v670_v56  ;;  %v522_v2 = vadd.f32 %v3895_v58, %v3885_v52 }
 0x104   :  { %854 = vmatprep.mubr.bf16.mxu0 %v3519_v51  ;;  %v3191_v60 = vpop.f32.mrf.mxu1  ;;  %1689 = vmatpush1.bf16.msra.mxu0 %v3282_v53  ;;  %v3263_v53 = vld [vmem:[%s4441_s7 + $0xc4] ss:$16 sps:$4 sm:$0xff]  }
 0x105   :  { %v318_v61 = vpop.f32.mrf.mxu0  ;;  %1690 = vmatprep.subr.bf16.mxu0 %v3290_v57  ;;  %v543_v18 = vadd.f32 %v3191_v60, %v3157_v59 }
 0x106   :  { %v534_v5 = vpop.f32.mrf.mxu1 }
 0x107   :  { %v3158_v6 = vpop.f32.mrf.mxu0  ;;  %v535_v7 = vadd.f32 %v534_v5, %v318_v61  ;;  %v622_v31 = vadd.f32 %v3831_v62, %v543_v18  ;;  %v3269_v5 = vld [vmem:[%s4441_s7 + $0xa4] ss:$16 sps:$4 sm:$0xff]  }
 0x108   :  { %v3192_v8 = vpop.f32.mrf.mxu1  ;;  %1691 = vmatpush1.bf16.msra.mxu0 %v3288_v63  ;;  %v646_v63 = vmax.f32 %v614_v38, 0.0 }
 0x109   :  { %v321_v9 = vpop.f32.mrf.mxu0  ;;  %v620_v14 = vadd.f32 %v3831_v62, %v535_v7  ;;  %1692 = vmatprep.subr.bf16.mxu0 %v3296_v4  ;;  %v546_v20 = vadd.f32 %v3192_v8, %v3158_v6  ;;  %v654_v55 = vmax.f32 %v622_v31, 0.0  ;;  %v3312_v4 = vld [vmem:[%s4441_s7 + $0x1c8] ss:$16 sps:$4 sm:$0xff]   ;;  %v616_v8 = vadd.f32 %v3831_v62, %v519_v1  ;;  %v3279_v31 = vld [vmem:[%s4441_s7 + $0x60] ss:$16 sps:$4 sm:$0xff]  }
 0x10a   :  { %v537_v16 = vpop.f32.mrf.mxu1  ;;  %v3299_v1 = vld [vmem:[%s4441_s7 + $0x4] ss:$16 sps:$4 sm:$0xff]  }
 0x10b   :  { %v3913_v17 = vpop.f32.mrf.mxu0  ;;  %855 = vmatmul.mubr.bf16.gmra.mxu0 %v671_v13  ;;  %v538_v22 = vadd.f32 %v537_v16, %v321_v9  ;;  %v652_v32 = vmax.f32 %v620_v14, 0.0  ;;  %v623_v34 = vadd.f32 %v3831_v62, %v546_v20  ;;  %v617_v9 = vadd.f32 %v3831_v62, %v522_v2  ;;  %v3275_v13 = vld [vmem:[%s4441_s7 + $0x84] ss:$16 sps:$4 sm:$0xff]   ;;  %v3326_v14 = vld [vmem:[%s4441_s7 + $0x18c] ss:$16 sps:$4 sm:$0xff]  }
 0x10c   :  { %864 = vmatprep.mubr.bf16.mxu0 %v3519_v51  ;;  %v3920_v25 = vpop.f32.mrf.mxu1  ;;  %1693 = vmatpush1.bf16.msra.mxu0 %v3294_v10  ;;  %v673_v10 = vpack.c.bf16 %v647_v0, %v646_v63  ;;  %v3291_v0 = vld [vmem:[%s4441_s7 + $0x20] ss:$16 sps:$4 sm:$0xff]  }
 0x10d   :  { %v334_v26 = vpop.f32.mrf.mxu0  ;;  %v621_v33 = vadd.f32 %v3831_v62, %v538_v22  ;;  %1694 = vmatprep.subr.bf16.mxu0 %v3302_v15  ;;  %v655_v56 = vmax.f32 %v623_v34, 0.0  ;;  %v559_v15 = vadd.f32 %v3920_v25, %v3913_v17  ;;  %v649_v28 = vmax.f32 %v617_v9, 0.0  ;;  %v3273_v17 = vld [vmem:[%s4441_s7 + $0x80] ss:$16 sps:$4 sm:$0xff]   ;;  %v3324_v25 = vld [vmem:[%s4441_s7 + $0x188] ss:$16 sps:$4 sm:$0xff]  }
 0x10e   :  { %v550_v21 = vpop.f32.mrf.mxu1  ;;  %v3330_v34 = vld [vmem:[%s4441_s7 + $0x168] ss:$16 sps:$4 sm:$0xff]   ;;  %v3303_v9 = vld [vmem:[%s4441_s7 + $0x1e0] ss:$16 sps:$4 sm:$0xff]  }
 0x10f   :  { %v3162_v29 = vpop.f32.mrf.mxu0  ;;  %v653_v35 = vmax.f32 %v621_v33, 0.0  ;;  %v551_v57 = vadd.f32 %v550_v21, %v334_v26  ;;  %v677_v58 = vpack.c.bf16 %v655_v56, %v654_v55  ;;  %v648_v26 = vmax.f32 %v616_v8, 0.0 }
 0x110   :  { %v3196_v36 = vpop.f32.mrf.mxu1  ;;  %1695 = vmatpush1.bf16.msra.mxu0 %v3300_v27  ;;  %v530_v27 = vadd.f32 %v3883_v50, %v3881_v49  ;;  %v626_v49 = vadd.f32 %v3831_v62, %v559_v15  ;;  %v3338_v15 = vld [vmem:[%s4441_s7 + $0x14c] ss:$16 sps:$4 sm:$0xff]  }
 0x111   :  { %v337_v37 = vpop.f32.mrf.mxu0  ;;  %v676_v44 = vpack.c.bf16 %v653_v35, %v652_v32  ;;  %1696 = vmatprep.subr.bf16.mxu0 %v3308_v19  ;;  %v624_v48 = vadd.f32 %v3831_v62, %v551_v57  ;;  %v562_v18 = vadd.f32 %v3196_v36, %v3162_v29  ;;  %v618_v19 = vadd.f32 %v3831_v62, %v527_v24  ;;  %v3287_v35 = vld [vmem:[%s4441_s7 + $0x44] ss:$16 sps:$4 sm:$0xff]  }
 0x112   :  { %v553_v47 = vpop.f32.mrf.mxu1  ;;  %v619_v21 = vadd.f32 %v3831_v62, %v530_v27  ;;  %v674_v29 = vpack.c.bf16 %v649_v28, %v648_v26  ;;  %v658_v36 = vmax.f32 %v626_v49, 0.0  ;;  %v3344_v26 = vld [vmem:[%s4441_s7 + $0x12c] ss:$16 sps:$4 sm:$0xff]   ;;  %v3342_v27 = vld [vmem:[%s4441_s7 + $0x128] ss:$16 sps:$4 sm:$0xff]  }
 0x113   :  { %865 = vmatmul.mubr.bf16.gmra.mxu0 %v672_v43  ;;  %905 = vmatmul.mubr.bf16.vlgmr.msra.gmra.mxu1 %v676_v44  ;;  %v554_v59 = vadd.f32 %v553_v47, %v337_v37  ;;  %v3947_v60 = vpop.f32.mrf.mxu0  ;;  %v656_v16 = vmax.f32 %v624_v48, 0.0  ;;  %v627_v50 = vadd.f32 %v3831_v62, %v562_v18  ;;  %v3285_v47 = vld [vmem:[%s4441_s7 + $0x40] ss:$16 sps:$4 sm:$0xff]  }
 0x114   :  { %874 = vmatprep.mubr.bf16.mxu0 %v3519_v51  ;;  %914 = vmatprep.mubr.bf16.mxu1 %v3519_v51  ;;  %v3949_v61 = vpop.f32.mrf.mxu1  ;;  %v3309_v18 = vld [vmem:[%s4441_s7 + $0x1c0] ss:$16 sps:$4 sm:$0xff]  }
 0x115   :  { %1488 = vmatpush1.bf16.msra.mxu1 %v3255_v45  ;;  %1697 = vmatpush2.bf16.msra.mxu0 %v3306_v46  ;;  %v625_v52 = vadd.f32 %v3831_v62, %v554_v59  ;;  %v350_v6 = vpop.f32.mrf.mxu0  ;;  %v659_v37 = vmax.f32 %v627_v50, 0.0  ;;  %v650_v45 = vmax.f32 %v618_v19, 0.0  ;;  %v651_v46 = vmax.f32 %v619_v21, 0.0  ;;  %v3315_v28 = vld [vmem:[%s4441_s7 + $0x1a0] ss:$16 sps:$4 sm:$0xff]  }
 0x116   :  { %1489 = vmatprep.subr.bf16.mxu1 %v3263_v53  ;;  %1698 = vmatprep.subr.bf16.mxu0 %v3314_v54  ;;  %v566_v7 = vpop.f32.mrf.mxu1  ;;  %v3293_v53 = vld [vmem:[%s4441_s7 + $0x24] ss:$16 sps:$4 sm:$0xff]   ;;  %v575_v2 = vadd.f32 %v3949_v61, %v3947_v60  ;;  %v3350_v50 = vld [vmem:[%s4441_s7 + $0x10c] ss:$16 sps:$4 sm:$0xff]  }
 0x117   :  { %v657_v20 = vmax.f32 %v625_v52, 0.0  ;;  %v3166_v22 = vpop.f32.mrf.mxu0  ;;  %v567_v38 = vadd.f32 %v566_v7, %v350_v6  ;;  %v679_v56 = vpack.c.bf16 %v659_v37, %v658_v36  ;;  %v675_v63 = vpack.c.bf16 %v651_v46, %v650_v45  ;;  %v3297_v52 = vld [vmem:[%s4441_s7] ss:$16 sps:$4 sm:$0xff]   ;;  %v3341_v37 = vld [vmem:[%s4441_s7 + $0x124] ss:$16 sps:$4 sm:$0xff]   ;;  %v3353_v45 = vld [vmem:[#allocation5 + $0xf8] sm:$0xff]  }
 0x118   :  { %v3200_v23 = vpop.f32.mrf.mxu1  ;;  %v630_v60 = vadd.f32 %v3831_v62, %v575_v2  ;;  %v702_v46 = vlaneseq }
 0x119   :  { %1490 = vmatpush1.bf16.msra.mxu1 %v3261_v3  ;;  %1699 = vmatpush2.bf16.msra.mxu0 %v3312_v4  ;;  %v678_v30 = vpack.c.bf16 %v657_v20, %v656_v16  ;;  %v353_v32 = vpop.f32.mrf.mxu0  ;;  %v628_v54 = vadd.f32 %v3831_v62, %v567_v38  ;;  %v578_v4 = vadd.f32 %v3200_v23, %v3166_v22  ;;  %v3336_v16 = vld [vmem:[%s4441_s7 + $0x148] ss:$16 sps:$4 sm:$0xff]   ;;  %v3317_v20 = vld [vmem:[%s4441_s7 + $0x1a4] ss:$16 sps:$4 sm:$0xff]  }
 0x11a   :  { %1491 = vmatprep.subr.bf16.mxu1 %v3269_v5  ;;  %1700 = vmatprep.subr.bf16.mxu0 %v3320_v41  ;;  %v569_v33 = vpop.f32.mrf.mxu1 }
 0x11b   :  { %875 = vmatmul.mubr.bf16.gmra.mxu0 %v673_v10  ;;  %915 = vmatmul.mubr.bf16.gmra.mxu1 %v677_v58  ;;  %v570_v42 = vadd.f32 %v569_v33, %v353_v32  ;;  %v4018_v43 = vpop.f32.mrf.mxu0  ;;  %v660_v3 = vmax.f32 %v628_v54, 0.0  ;;  %v3305_v58 = vld [vmem:[%s4441_s7 + $0x1e4] ss:$16 sps:$4 sm:$0xff]   ;;  %v631_v61 = vadd.f32 %v3831_v62, %v578_v4  ;;  %v3321_v32 = vld [vmem:[%s4441_s7 + $0x180] ss:$16 sps:$4 sm:$0xff]  }
 0x11c   :  { %884 = vmatprep.mubr.bf16.mxu0 %v3519_v51  ;;  %924 = vmatprep.mubr.bf16.mxu1 %v3519_v51  ;;  %v4020_v44 = vpop.f32.mrf.mxu1  ;;  %v3311_v10 = vld [vmem:[%s4441_s7 + $0x1c4] ss:$16 sps:$4 sm:$0xff]  }
 0x11d   :  { %1492 = vmatpush1.bf16.msra.mxu1 %v3267_v11  ;;  %1701 = vmatpush2.bf16.msra.mxu0 %v3318_v12  ;;  %v629_v55 = vadd.f32 %v3831_v62, %v570_v42  ;;  %v366_v57 = vpop.f32.mrf.mxu0  ;;  %v662_v11 = vmax.f32 %v630_v60, 0.0  ;;  %v663_v12 = vmax.f32 %v631_v61, 0.0  ;;  %v3329_v33 = vld [vmem:[%s4441_s7 + $0x164] ss:$16 sps:$4 sm:$0xff]   ;;  %v3339_v42 = vld [vmem:[%s4441_s7 + $0x120] ss:$16 sps:$4 sm:$0xff]  }
 0x11e   :  { %1493 = vmatprep.subr.bf16.mxu1 %v3275_v13  ;;  %1702 = vmatprep.subr.bf16.mxu0 %v3326_v14  ;;  %v582_v59 = vpop.f32.mrf.mxu1 }
 0x11f   :  { %v661_v5 = vmax.f32 %v629_v55, 0.0  ;;  %v3170_v41 = vpop.f32.mrf.mxu0  ;;  %v583_v13 = vadd.f32 %v582_v59, %v366_v57  ;;  %v681_v24 = vpack.c.bf16 %v663_v12, %v662_v11  ;;  %v700_v55 = vld [vmem:[%s4440_s6] sm:$0x3]  ;;  %v3355_v11 = vld [vmem:[#allocation5 + $0x70] sm:$0xff]  }
 0x120   :  { %v3204_v48 = vpop.f32.mrf.mxu1  ;;  %v3357_v12 = vld [vmem:[#allocation5 + $0xf0] sm:$0xff]  }
 0x121   :  { %1494 = vmatpush1.bf16.msra.mxu1 %v3273_v17  ;;  %1703 = vmatpush2.bf16.msra.mxu0 %v3324_v25  ;;  %v680_v6 = vpack.c.bf16 %v661_v5, %v660_v3  ;;  %v369_v7 = vpop.f32.mrf.mxu0  ;;  %v632_v22 = vadd.f32 %v3831_v62, %v583_v13  ;;  %v3323_v17 = vld [vmem:[%s4441_s7 + $0x184] ss:$16 sps:$4 sm:$0xff]   ;;  %v591_v25 = vadd.f32 %v4020_v44, %v4018_v43  ;;  %v3345_v43 = vld [vmem:[%s4441_s7 + $0x100] ss:$16 sps:$4 sm:$0xff]   ;;  %v3351_v44 = vld [vmem:[#allocation5 + $0x78] sm:$0xff]  }
 0x122   :  { %1495 = vmatprep.subr.bf16.mxu1 %v3281_v39  ;;  %1704 = vmatprep.subr.bf16.mxu0 %v3332_v40  ;;  %v585_v8 = vpop.f32.mrf.mxu1  ;;  %v594_v40 = vadd.f32 %v3204_v48, %v3170_v41 }
 0x123   :  { %885 = vmatmul.mubr.bf16.gmra.mxu0 %v674_v29  ;;  %925 = vmatmul.mubr.bf16.gmra.mxu1 %v678_v30  ;;  %v586_v14 = vadd.f32 %v585_v8, %v369_v7  ;;  %v664_v39 = vmax.f32 %v632_v22, 0.0  ;;  %v3348_v30 = vld [vmem:[%s4441_s7 + $0x108] ss:$16 sps:$4 sm:$0xff]   ;;  %v634_v19 = vadd.f32 %v3831_v62, %v591_v25  ;;  %v3358_v22 = vld [vmem:[#allocation5 + $0xb0] sm:$0xff]  }
 0x124   :  { %894 = vmatprep.mubr.bf16.mxu0 %v3519_v51  ;;  %934 = vmatprep.mubr.bf16.mxu1 %v3519_v51  ;;  %v635_v21 = vadd.f32 %v3831_v62, %v594_v40  ;;  %v3352_v7 = vld [vmem:[#allocation5 + $0x38] sm:$0xff]  }
 0x125   :  { %1496 = vmatpush1.bf16.msra.mxu1 %v3279_v31  ;;  %1705 = vmatpush2.bf16.msra.mxu0 %v3330_v34  ;;  %v633_v23 = vadd.f32 %v3831_v62, %v586_v14  ;;  %v3327_v31 = vld [vmem:[%s4441_s7 + $0x160] ss:$16 sps:$4 sm:$0xff]   ;;  %v3335_v34 = vld [vmem:[%s4441_s7 + $0x144] ss:$16 sps:$4 sm:$0xff]   ;;  %v3354_v8 = vld [vmem:[#allocation5 + $0xb8] sm:$0xff]  }
 0x126   :  { %1497 = vmatprep.subr.bf16.mxu1 %v3287_v35  ;;  %1706 = vmatprep.subr.bf16.mxu0 %v3338_v15  ;;  %v666_v35 = vmax.f32 %v634_v19, 0.0  ;;  %v667_v36 = vmax.f32 %v635_v21, 0.0  ;;  %v3333_v62 = vld [vmem:[%s4441_s7 + $0x140] ss:$16 sps:$4 sm:$0xff]  }
 0x127   :  { %v665_v49 = vmax.f32 %v633_v23, 0.0  ;;  %v3365_v19 = vld [vmem:[#allocation5 + $0xe0] sm:$0xff]  }
 0x128   :  { %v683_v38 = vpack.c.bf16 %v667_v36, %v666_v35  ;;  %v3364_v36 = vld [vmem:[#allocation5 + $0x20] sm:$0xff]  }
 0x129   :  { %1498 = vmatpush1.bf16.msra.mxu1 %v3285_v47  ;;  %1707 = vmatpush2.bf16.msra.mxu0 %v3336_v16  ;;  %v682_v29 = vpack.c.bf16 %v665_v49, %v664_v39  ;;  %v4119_v47 = vshrl.u32 %v702_v46, 7  ;;  %v3360_v49 = vld [vmem:[#allocation5 + $0x28] sm:$0xff]  }
 0x12a   :  { %1499 = vmatprep.subr.bf16.mxu1 %v3293_v53  ;;  %1708 = vmatprep.subr.bf16.mxu0 %v3344_v26  ;;  %v3359_v26 = vld [vmem:[#allocation5 + $0x68] sm:$0xff]  }
 0x12b   :  { %895 = vmatmul.mubr.bf16.gmra.mxu0 %v675_v63  ;;  %935 = vmatmul.mubr.bf16.gmra.mxu1 %v679_v56  ;;  %v708_v53 = vsub.s32 1, %v4119_v47  ;;  %v704_v54 = vsub.s32 0, %v4119_v47 }
 0x12c   :  { %944 = vmatprep.mubr.bf16.mxu1 %v3519_v51 }
 0x12d   :  { %1500 = vmatpush1.bf16.msra.mxu1 %v3291_v0  ;;  %1709 = vmatpush2.bf16.msra.mxu0 %v3342_v27  ;;  %v4128_v57 = vrot.slane %v700_v55, %v708_v53  ;;  %v4132_v59 = vrot.slane %v700_v55, %v704_v54  ;;  %v3361_v27 = vld [vmem:[#allocation5 + $0xe8] sm:$0xff]  }
 0x12e   :  { %1501 = vmatprep.subr.bf16.mxu1 %v3299_v1  ;;  %1710 = vmatprep.subr.bf16.mxu0 %v3350_v50  ;;  %v3362_v50 = vld [vmem:[#allocation5 + $0xa8] sm:$0xff]  }
 0x131   :  { %1502 = vmatpush1.bf16.msra.mxu1 %v3297_v52  ;;  %1711 = vmatpush2.bf16.msra.mxu0 %v3348_v30 }
 0x132   :  { %1503 = vmatprep.subr.bf16.mxu1 %v3305_v58  ;;  %3025 = vmatprep.subr.bf16.mxu0 %v3353_v45 }
 0x133   :  { %945 = vmatmul.mubr.bf16.gmra.mxu1 %v680_v6 }
 0x134   :  { %954 = vmatprep.mubr.bf16.mxu1 %v3519_v51 }
 0x135   :  { %1504 = vmatpush2.bf16.msra.mxu1 %v3303_v9 }
 0x136   :  { %1505 = vmatprep.subr.bf16.mxu1 %v3311_v10 }
 0x139   :  { %1506 = vmatpush2.bf16.msra.mxu1 %v3309_v18 }
 0x13a   :  { %1507 = vmatprep.subr.bf16.mxu1 %v3317_v20  ;;  %v3356_v20 = vld [vmem:[#allocation5 + $0x30] sm:$0xff]  }
 0x13b   :  { %955 = vmatmul.mubr.bf16.gmra.mxu1 %v681_v24 }
 0x13c   :  { %964 = vmatprep.mubr.bf16.mxu1 %v3519_v51 }
 0x13d   :  { %1508 = vmatpush2.bf16.msra.mxu1 %v3315_v28 }
 0x13e   :  { %1509 = vmatprep.subr.bf16.mxu1 %v3323_v17 }
 0x141   :  { %1510 = vmatpush2.bf16.msra.mxu1 %v3321_v32 }
 0x142   :  { %1511 = vmatprep.subr.bf16.mxu1 %v3329_v33  ;;  %v3363_v33 = vld [vmem:[#allocation5 + $0x60] sm:$0xff]  }
 0x143   :  { %965 = vmatmul.mubr.bf16.gmra.mxu1 %v682_v29 }
 0x144   :  { %974 = vmatprep.mubr.bf16.mxu1 %v3519_v51  ;;  %v3347_v51 = vld [vmem:[%s4441_s7 + $0x104] ss:$16 sps:$4 sm:$0xff]  }
 0x145   :  { %1512 = vmatpush2.bf16.msra.mxu1 %v3327_v31 }
 0x146   :  { %1513 = vmatprep.subr.bf16.mxu1 %v3335_v34 }
 0x149   :  { %1514 = vmatpush2.bf16.msra.mxu1 %v3333_v62  ;;  %v3366_v62 = vld [vmem:[#allocation5 + $0xa0] sm:$0xff]  }
 0x14a   :  { %1515 = vmatprep.subr.bf16.mxu1 %v3341_v37 }
 0x14b   :  { %975 = vmatmul.mubr.bf16.gmra.mxu1 %v683_v38 }
 0x14d   :  { %1516 = vmatpush2.bf16.msra.mxu1 %v3339_v42  ;;  %v3367_v42 = vld [vmem:[#allocation5 + $0x58] sm:$0xff]  }
 0x14e   :  { %1517 = vmatprep.subr.bf16.mxu1 %v3347_v51  ;;  %v3369_v51 = vld [vmem:[#allocation5 + $0xd8] sm:$0xff]  }
 0x151   :  { %1518 = vmatpush2.bf16.msra.mxu1 %v3345_v43 }
 0x152   :  { %2913 = vmatprep.subr.bf16.mxu1 %v3351_v44 }
 0x1b3   :  { %v826_v56 = vpop.f32.mrf.mxu0 }
 0x1b4   :  { %v827_v3 = vadd.f32 %v826_v56, %v4132_v59  ;;  %v3368_v56 = vld [vmem:[#allocation5 + $0x18] sm:$0xff]  }
 0x1b5   :  { %v828_v63 = vpop.f32.mrf.mxu0 }
 0x1b6   :  { %v829_v1 = vadd.f32 %v828_v63, %v4128_v57  ;;  %v985_v60 = vmax.f32 %v827_v3, 0.0  ;;  %v3370_v63 = vld [vmem:[#allocation5 + $0x98] sm:$0xff]   ;;  %v3373_v3 = vld [vmem:[#allocation5 + $0xd0] sm:$0xff]  }
 0x1b7   :  { %v830_v0 = vpop.f32.mrf.mxu0 }
 0x1b8   :  { %v831_v2 = vadd.f32 %v830_v0, %v4132_v59  ;;  %v986_v52 = vmax.f32 %v829_v1, 0.0 }
 0x1b9   :  { %v832_v4 = vpop.f32.mrf.mxu0 }
 0x1ba   :  { %v833_v5 = vadd.f32 %v832_v4, %v4128_v57  ;;  %v987_v41 = vmax.f32 %v831_v2, 0.0  ;;  %v3371_v2 = vld [vmem:[#allocation5 + $0x50] sm:$0xff]  }
 0x1bb   :  { %v836_v48 = vpop.f32.mrf.mxu0 }
 0x1bc   :  { %v988_v58 = vmax.f32 %v833_v5, 0.0  ;;  %v1049_v9 = vpack.c.bf16 %v987_v41, %v985_v60  ;;  %v837_v15 = vadd.f32 %v836_v48, %v4132_v59  ;;  %v3374_v60 = vld [vmem:[#allocation5 + $0x90] sm:$0xff]  }
 0x1bd   :  { %v838_v61 = vpop.f32.mrf.mxu0 }
 0x1be   :  { %v1050_v6 = vpack.c.bf16 %v988_v58, %v986_v52  ;;  %v839_v13 = vadd.f32 %v838_v61, %v4128_v57  ;;  %v989_v25 = vmax.f32 %v837_v15, 0.0  ;;  %v3372_v58 = vld [vmem:[#allocation5 + $0x10] sm:$0xff]  }
 0x1bf   :  { %v840_v10 = vpop.f32.mrf.mxu0 }
 0x1c0   :  { %v841_v14 = vadd.f32 %v840_v10, %v4132_v59  ;;  %1519 = vmatprep.mubr.bf16.mxu1 %v1050_v6  ;;  %1712 = vmatprep.mubr.bf16.mxu0 %v1050_v6  ;;  %v990_v28 = vmax.f32 %v839_v13, 0.0 }
 0x1c1   :  { %v842_v16 = vpop.f32.mrf.mxu0  ;;  %1520 = vmatmul.mubr.bf16.vlgmr.msra.gmra.mxu1 %v1049_v9  ;;  %1713 = vmatmul.mubr.bf16.vlgmr.msra.gmra.mxu0 %v1049_v9  ;;  %v3377_v9 = vld [vmem:[#allocation5 + $0xc8] sm:$0xff]  }
 0x1c2   :  { %v843_v18 = vadd.f32 %v842_v16, %v4128_v57  ;;  %2914 = vmatpush3.bf16.msra.mxu1 %v3352_v7  ;;  %3026 = vmatpush3.bf16.msra.mxu0 %v3354_v8  ;;  %v991_v23 = vmax.f32 %v841_v14, 0.0  ;;  %v3375_v8 = vld [vmem:[#allocation5 + $0x48] sm:$0xff]  }
 0x1c3   :  { %v846_v24 = vpop.f32.mrf.mxu0  ;;  %2915 = vmatprep.subr.bf16.mxu1 %v3355_v11  ;;  %3027 = vmatprep.subr.bf16.mxu0 %v3357_v12  ;;  %v3376_v16 = vld [vmem:[#allocation5 + $0x8] sm:$0xff]  }
 0x1c4   :  { %v992_v17 = vmax.f32 %v843_v18, 0.0  ;;  %v1051_v30 = vpack.c.bf16 %v991_v23, %v989_v25  ;;  %v847_v31 = vadd.f32 %v846_v24, %v4132_v59  ;;  %v3378_v18 = vld [vmem:[#allocation5 + $0x88] sm:$0xff]   ;;  %v3379_v24 = vld [vmem:[#allocation5 + $0x40] sm:$0xff]  }
 0x1c5   :  { %v848_v39 = vpop.f32.mrf.mxu0 }
 0x1c6   :  { %v1052_v40 = vpack.c.bf16 %v992_v17, %v990_v28  ;;  %2916 = vmatpush3.bf16.msra.mxu1 %v3356_v20  ;;  %3028 = vmatpush3.bf16.msra.mxu0 %v3358_v22  ;;  %v849_v21 = vadd.f32 %v848_v39, %v4128_v57  ;;  %v993_v45 = vmax.f32 %v847_v31, 0.0 }
 0x1c7   :  { %v850_v32 = vpop.f32.mrf.mxu0  ;;  %2917 = vmatprep.subr.bf16.mxu1 %v3359_v26  ;;  %3029 = vmatprep.subr.bf16.mxu0 %v3361_v27  ;;  %v3381_v26 = vld [vmem:[#allocation5 + $0xc0] sm:$0xff]  }
 0x1c8   :  { %v851_v29 = vadd.f32 %v850_v32, %v4132_v59  ;;  %1529 = vmatprep.mubr.bf16.mxu1 %v1052_v40  ;;  %1722 = vmatprep.mubr.bf16.mxu0 %v1052_v40  ;;  %v994_v43 = vmax.f32 %v849_v21, 0.0 }
 0x1c9   :  { %v852_v34 = vpop.f32.mrf.mxu0  ;;  %1530 = vmatmul.mubr.bf16.gmra.mxu1 %v1051_v30  ;;  %1723 = vmatmul.mubr.bf16.gmra.mxu0 %v1051_v30 }
 0x1ca   :  { %v853_v35 = vadd.f32 %v852_v34, %v4128_v57  ;;  %2918 = vmatpush3.bf16.msra.mxu1 %v3360_v49  ;;  %3030 = vmatpush3.bf16.msra.mxu0 %v3362_v50  ;;  %v995_v37 = vmax.f32 %v851_v29, 0.0  ;;  %v3380_v49 = vld [vmem:[#allocation5] sm:$0xff]  }
 0x1cb   :  { %v856_v38 = vpop.f32.mrf.mxu0  ;;  %2919 = vmatprep.subr.bf16.mxu1 %v3363_v33  ;;  %3031 = vmatprep.subr.bf16.mxu0 %v3365_v19 }
 0x1cc   :  { %v996_v44 = vmax.f32 %v853_v35, 0.0  ;;  %v1053_v0 = vpack.c.bf16 %v995_v37, %v993_v45  ;;  %v857_v41 = vadd.f32 %v856_v38, %v4132_v59 }
 0x1cd   :  { %v858_v46 = vpop.f32.mrf.mxu0 }
 0x1ce   :  { %v1054_v55 = vpack.c.bf16 %v996_v44, %v994_v43  ;;  %2920 = vmatpush3.bf16.msra.mxu1 %v3364_v36  ;;  %3032 = vmatpush3.bf16.msra.mxu0 %v3366_v62  ;;  %v859_v4 = vadd.f32 %v858_v46, %v4128_v57  ;;  %v997_v12 = vmax.f32 %v857_v41, 0.0 }
 0x1cf   :  { %v860_v1 = vpop.f32.mrf.mxu0  ;;  %2921 = vmatprep.subr.bf16.mxu1 %v3367_v42  ;;  %3033 = vmatprep.subr.bf16.mxu0 %v3369_v51 }
 0x1d0   :  { %v861_v5 = vadd.f32 %v860_v1, %v4132_v59  ;;  %1539 = vmatprep.mubr.bf16.mxu1 %v1054_v55  ;;  %1732 = vmatprep.mubr.bf16.mxu0 %v1054_v55  ;;  %v998_v10 = vmax.f32 %v859_v4, 0.0 }
 0x1d1   :  { %v862_v48 = vpop.f32.mrf.mxu0  ;;  %1540 = vmatmul.mubr.bf16.gmra.mxu1 %v1053_v0  ;;  %1733 = vmatmul.mubr.bf16.gmra.mxu0 %v1053_v0 }
 0x1d2   :  { %v863_v52 = vadd.f32 %v862_v48, %v4128_v57  ;;  %2922 = vmatpush3.bf16.msra.mxu1 %v3368_v56  ;;  %3034 = vmatpush3.bf16.msra.mxu0 %v3370_v63  ;;  %v999_v61 = vmax.f32 %v861_v5, 0.0 }
 0x1d3   :  { %v866_v6 = vpop.f32.mrf.mxu0  ;;  %v4150_v7 = vpop.f32.mrf.mxu1  ;;  %2923 = vmatprep.subr.bf16.mxu1 %v3371_v2  ;;  %3035 = vmatprep.subr.bf16.mxu0 %v3373_v3 }
 0x1d4   :  { %v1000_v11 = vmax.f32 %v863_v52, 0.0  ;;  %v1055_v20 = vpack.c.bf16 %v999_v61, %v997_v12  ;;  %v867_v17 = vadd.f32 %v866_v6, %v4132_v59 }
 0x1d5   :  { %v868_v13 = vpop.f32.mrf.mxu0  ;;  %v4152_v14 = vpop.f32.mrf.mxu1 }
 0x1d6   :  { %v1056_v15 = vpack.c.bf16 %v1000_v11, %v998_v10  ;;  %2924 = vmatpush3.bf16.msra.mxu1 %v3372_v58  ;;  %3036 = vmatpush3.bf16.msra.mxu0 %v3374_v60  ;;  %v869_v27 = vadd.f32 %v868_v13, %v4128_v57  ;;  %v1001_v21 = vmax.f32 %v867_v17, 0.0 }
 0x1d7   :  { %v870_v22 = vpop.f32.mrf.mxu0  ;;  %v4154_v23 = vpop.f32.mrf.mxu1  ;;  %2925 = vmatprep.subr.bf16.mxu1 %v3375_v8  ;;  %3037 = vmatprep.subr.bf16.mxu0 %v3377_v9 }
 0x1d8   :  { %v871_v28 = vadd.f32 %v870_v22, %v4132_v59  ;;  %1549 = vmatprep.mubr.bf16.mxu1 %v1056_v15  ;;  %1742 = vmatprep.mubr.bf16.mxu0 %v1056_v15  ;;  %v1002_v33 = vmax.f32 %v869_v27, 0.0 }
 0x1d9   :  { %v872_v25 = vpop.f32.mrf.mxu0  ;;  %1550 = vmatmul.mubr.bf16.gmra.mxu1 %v1055_v20  ;;  %1743 = vmatmul.mubr.bf16.gmra.mxu0 %v1055_v20  ;;  %v4159_v39 = vpop.f32.mrf.mxu1  ;;  %v909_v20 = vadd.f32 %v4152_v14, %v4128_v57 }
 0x1da   :  { %v873_v40 = vadd.f32 %v872_v25, %v4128_v57  ;;  %2926 = vmatpush3.bf16.msra.mxu1 %v3376_v16  ;;  %3038 = vmatpush3.bf16.msra.mxu0 %v3378_v18  ;;  %v1003_v50 = vmax.f32 %v871_v28, 0.0  ;;  %v913_v27 = vadd.f32 %v4159_v39, %v4128_v57 }
 0x1db   :  { %v876_v30 = vpop.f32.mrf.mxu0  ;;  %v4162_v32 = vpop.f32.mrf.mxu1  ;;  %2927 = vmatprep.subr.bf16.mxu1 %v3379_v24  ;;  %3039 = vmatprep.subr.bf16.mxu0 %v3381_v26 }
 0x1dc   :  { %v1004_v19 = vmax.f32 %v873_v40, 0.0  ;;  %v1057_v35 = vpack.c.bf16 %v1003_v50, %v1001_v21  ;;  %v877_v42 = vadd.f32 %v876_v30, %v4132_v59 }
 0x1dd   :  { %v878_v29 = vpop.f32.mrf.mxu0  ;;  %v4164_v31 = vpop.f32.mrf.mxu1 }
 0x1de   :  { %v1058_v34 = vpack.c.bf16 %v1004_v19, %v1002_v33  ;;  %2928 = vmatpush3.bf16.msra.mxu1 %v3380_v49  ;;  %v879_v37 = vadd.f32 %v878_v29, %v4128_v57  ;;  %v1005_v0 = vmax.f32 %v877_v42, 0.0  ;;  %v1018_v33 = vmax.f32 %v909_v20, 0.0 }
 0x1df   :  { %v880_v36 = vpop.f32.mrf.mxu0  ;;  %v4166_v62 = vpop.f32.mrf.mxu1  ;;  %v1020_v19 = vmax.f32 %v913_v27, 0.0 }
 0x1e0   :  { %v881_v38 = vadd.f32 %v880_v36, %v4132_v59  ;;  %1559 = vmatprep.mubr.bf16.mxu1 %v1058_v34  ;;  %1752 = vmatprep.mubr.bf16.mxu0 %v1058_v34  ;;  %v1006_v56 = vmax.f32 %v879_v37, 0.0  ;;  %v907_v36 = vadd.f32 %v4150_v7, %v4132_v59  ;;  %v911_v37 = vadd.f32 %v4154_v23, %v4132_v59 }
 0x1e1   :  { %v882_v51 = vpop.f32.mrf.mxu0  ;;  %1560 = vmatmul.mubr.bf16.gmra.mxu1 %v1057_v35  ;;  %1753 = vmatmul.mubr.bf16.gmra.mxu0 %v1057_v35  ;;  %v922_v43 = vpop.f32.mrf.mxu1 }
 0x1e2   :  { %v883_v44 = vadd.f32 %v882_v51, %v4128_v57  ;;  %v1007_v45 = vmax.f32 %v881_v38, 0.0  ;;  %v919_v51 = vadd.f32 %v4164_v31, %v4128_v57  ;;  %v1017_v7 = vmax.f32 %v907_v36, 0.0 }
 0x1e3   :  { %v886_v46 = vpop.f32.mrf.mxu0  ;;  %v4172_v55 = vpop.f32.mrf.mxu1  ;;  %v917_v31 = vadd.f32 %v4162_v32, %v4132_v59 }
 0x1e4   :  { %v1008_v63 = vmax.f32 %v883_v44, 0.0  ;;  %v1059_v4 = vpack.c.bf16 %v1007_v45, %v1005_v0  ;;  %v887_v58 = vadd.f32 %v886_v46, %v4132_v59  ;;  %v923_v44 = vadd.f32 %v922_v43, %v4128_v57 }
 0x1e5   :  { %v888_v1 = vpop.f32.mrf.mxu0  ;;  %v4174_v2 = vpop.f32.mrf.mxu1  ;;  %v1066_v45 = vpack.c.bf16 %v1020_v19, %v1018_v33  ;;  %v1022_v23 = vmax.f32 %v919_v51, 0.0  ;;  %v921_v43 = vadd.f32 %v4166_v62, %v4132_v59  ;;  %v927_v62 = vadd.f32 %v4172_v55, %v4132_v59 }
 0x1e6   :  { %v1060_v3 = vpack.c.bf16 %v1008_v63, %v1006_v56  ;;  %v889_v48 = vadd.f32 %v888_v1, %v4128_v57  ;;  %v1009_v13 = vmax.f32 %v887_v58, 0.0  ;;  %v1019_v56 = vmax.f32 %v911_v37, 0.0 }
 0x1e7   :  { %v890_v5 = vpop.f32.mrf.mxu0  ;;  %v4176_v41 = vpop.f32.mrf.mxu1  ;;  %v1024_v0 = vmax.f32 %v923_v44, 0.0  ;;  %v1021_v58 = vmax.f32 %v917_v31, 0.0 }
 0x1e8   :  { %v891_v52 = vadd.f32 %v890_v5, %v4132_v59  ;;  %1569 = vmatprep.mubr.bf16.mxu1 %v1060_v3  ;;  %1762 = vmatprep.mubr.bf16.mxu0 %v1060_v3  ;;  %v1010_v11 = vmax.f32 %v889_v48, 0.0  ;;  %v1065_v3 = vpack.c.bf16 %v1019_v56, %v1017_v7 }
 0x1e9   :  { %v892_v60 = vpop.f32.mrf.mxu0  ;;  %1570 = vmatmul.mubr.bf16.gmra.mxu1 %v1059_v4  ;;  %1763 = vmatmul.mubr.bf16.gmra.mxu0 %v1059_v4  ;;  %v932_v61 = vpop.f32.mrf.mxu1  ;;  %v929_v4 = vadd.f32 %v4174_v2, %v4128_v57  ;;  %v1068_v48 = vpack.c.bf16 %v1024_v0, %v1022_v23  ;;  %v931_v2 = vadd.f32 %v4176_v41, %v4132_v59 }
 0x1ea   :  { %v893_v6 = vadd.f32 %v892_v60, %v4128_v57  ;;  %v1011_v8 = vmax.f32 %v891_v52, 0.0  ;;  %v933_v5 = vadd.f32 %v932_v61, %v4128_v57  ;;  %v1023_v60 = vmax.f32 %v921_v43, 0.0 }
 0x1eb   :  { %v896_v9 = vpop.f32.mrf.mxu0  ;;  %v4182_v10 = vpop.f32.mrf.mxu1  ;;  %v1027_v20 = vmax.f32 %v931_v2, 0.0 }
 0x1ec   :  { %v1012_v12 = vmax.f32 %v893_v6, 0.0  ;;  %v1061_v22 = vpack.c.bf16 %v1011_v8, %v1009_v13  ;;  %v897_v25 = vadd.f32 %v896_v9, %v4132_v59  ;;  %v1026_v6 = vmax.f32 %v929_v4, 0.0  ;;  %v3382_v9 = vld [vmem:[#allocation5 + $0x80] sm:$0xff]  }
 0x1ed   :  { %v898_v15 = vpop.f32.mrf.mxu0  ;;  %v4184_v16 = vpop.f32.mrf.mxu1  ;;  %v1028_v8 = vmax.f32 %v933_v5, 0.0  ;;  %3040 = vmatpush3.bf16.msra.mxu0 %v3382_v9  ;;  %v937_v41 = vadd.f32 %v4182_v10, %v4132_v59 }
 0x1ee   :  { %v1062_v18 = vpack.c.bf16 %v1012_v12, %v1010_v11  ;;  %v899_v28 = vadd.f32 %v898_v15, %v4128_v57  ;;  %v1013_v29 = vmax.f32 %v897_v25, 0.0  ;;  %v1067_v11 = vpack.c.bf16 %v1023_v60, %v1021_v58 }
 0x1ef   :  { %v900_v24 = vpop.f32.mrf.mxu0  ;;  %v4188_v26 = vpop.f32.mrf.mxu1  ;;  %v939_v61 = vadd.f32 %v4184_v16, %v4128_v57  ;;  %v1070_v13 = vpack.c.bf16 %v1028_v8, %v1026_v6 }
 0x1f0   :  { %v901_v17 = vadd.f32 %v900_v24, %v4132_v59  ;;  %1579 = vmatprep.mubr.bf16.mxu1 %v1062_v18  ;;  %1772 = vmatprep.mubr.bf16.mxu0 %v1062_v18  ;;  %v1014_v39 = vmax.f32 %v899_v28, 0.0  ;;  %v1025_v18 = vmax.f32 %v927_v62, 0.0  ;;  %v941_v16 = vadd.f32 %v4188_v26, %v4132_v59 }
 0x1f1   :  { %v902_v40 = vpop.f32.mrf.mxu0  ;;  %1580 = vmatmul.mubr.bf16.gmra.mxu1 %v1061_v22  ;;  %1773 = vmatmul.mubr.bf16.gmra.mxu0 %v1061_v22  ;;  %v942_v49 = vpop.f32.mrf.mxu1  ;;  %v1030_v22 = vmax.f32 %v939_v61, 0.0 }
 0x1f2   :  { %v903_v14 = vadd.f32 %v902_v40, %v4128_v57  ;;  %v1015_v50 = vmax.f32 %v901_v17, 0.0  ;;  %v943_v12 = vadd.f32 %v942_v49, %v4128_v57  ;;  %v1069_v55 = vpack.c.bf16 %v1027_v20, %v1025_v18  ;;  %v1145_v18 = vld [vmem:[%s4442_s8] sm:$0xf] }
 0x1f3   :  { %v4196_v30 = vpop.f32.mrf.mxu1  ;;  %v1029_v49 = vmax.f32 %v937_v41, 0.0 }
 0x1f4   :  { %v1016_v21 = vmax.f32 %v903_v14, 0.0  ;;  %v1063_v38 = vpack.c.bf16 %v1015_v50, %v1013_v29  ;;  %v1032_v24 = vmax.f32 %v943_v12, 0.0  ;;  %v1031_v14 = vmax.f32 %v941_v16, 0.0 }
 0x1f5   :  { %v948_v34 = vpop.f32.mrf.mxu1  ;;  %v947_v10 = vadd.f32 %v4196_v30, %v4132_v59 }
 0x1f6   :  { %v1064_v35 = vpack.c.bf16 %v1016_v21, %v1014_v39  ;;  %v949_v28 = vadd.f32 %v948_v34, %v4128_v57  ;;  %v1072_v25 = vpack.c.bf16 %v1032_v24, %v1030_v22  ;;  %v1071_v39 = vpack.c.bf16 %v1031_v14, %v1029_v49 }
 0x1f7   :  { %v4202_v42 = vpop.f32.mrf.mxu1  ;;  %v1033_v36 = vmax.f32 %v947_v10, 0.0  ;;  %v4253_v22 = vrot.slane %v1145_v18, %v708_v53 }
 0x1f8   :  { %1589 = vmatprep.mubr.bf16.mxu1 %v1064_v35  ;;  %1782 = vmatprep.mubr.bf16.mxu0 %v1064_v35  ;;  %v1034_v50 = vmax.f32 %v949_v28, 0.0  ;;  %v951_v26 = vadd.f32 %v4202_v42, %v4132_v59 }
 0x1f9   :  { %1590 = vmatmul.mubr.bf16.gmra.mxu1 %v1063_v38  ;;  %1783 = vmatmul.mubr.bf16.gmra.mxu0 %v1063_v38  ;;  %v952_v46 = vpop.f32.mrf.mxu1 }
 0x1fa   :  { %1599 = vmatprep.mubr.bf16.mxu1 %v1066_v45  ;;  %1792 = vmatprep.mubr.bf16.mxu0 %v1066_v45  ;;  %v953_v17 = vadd.f32 %v952_v46, %v4128_v57  ;;  %v1035_v37 = vmax.f32 %v951_v26, 0.0 }
 0x1fb   :  { %v4207_v63 = vpop.f32.mrf.mxu1 }
 0x1fc   :  { %v1036_v33 = vmax.f32 %v953_v17, 0.0  ;;  %v1073_v45 = vpack.c.bf16 %v1035_v37, %v1033_v36  ;;  %v957_v30 = vadd.f32 %v4207_v63, %v4132_v59 }
 0x1fd   :  { %v958_v1 = vpop.f32.mrf.mxu1 }
 0x1fe   :  { %v959_v21 = vadd.f32 %v958_v1, %v4128_v57  ;;  %v1074_v34 = vpack.c.bf16 %v1036_v33, %v1034_v50  ;;  %v1037_v0 = vmax.f32 %v957_v30, 0.0 }
 0x1ff   :  { %v960_v52 = vpop.f32.mrf.mxu1 }
 0x200   :  { %v1038_v38 = vmax.f32 %v959_v21, 0.0  ;;  %v961_v42 = vadd.f32 %v960_v52, %v4132_v59 }
 0x201   :  { %1600 = vmatmul.mubr.bf16.gmra.mxu1 %v1065_v3  ;;  %1793 = vmatmul.mubr.bf16.gmra.mxu0 %v1065_v3  ;;  %v962_v32 = vpop.f32.mrf.mxu1 }
 0x202   :  { %1609 = vmatprep.mubr.bf16.mxu1 %v1068_v48  ;;  %1802 = vmatprep.mubr.bf16.mxu0 %v1068_v48  ;;  %v963_v29 = vadd.f32 %v962_v32, %v4128_v57  ;;  %v1039_v1 = vmax.f32 %v961_v42, 0.0 }
 0x203   :  { %v966_v15 = vpop.f32.mrf.mxu1 }
 0x204   :  { %v1040_v51 = vmax.f32 %v963_v29, 0.0  ;;  %v1075_v4 = vpack.c.bf16 %v1039_v1, %v1037_v0  ;;  %v967_v63 = vadd.f32 %v966_v15, %v4132_v59  ;;  %v1157_v15 = vsub.s32 2, %v4119_v47 }
 0x205   :  { %v968_v27 = vpop.f32.mrf.mxu1 }
 0x206   :  { %v969_v46 = vadd.f32 %v968_v27, %v4128_v57  ;;  %v1076_v56 = vpack.c.bf16 %v1040_v51, %v1038_v38  ;;  %v1041_v60 = vmax.f32 %v967_v63, 0.0  ;;  %v4259_v27 = vrot.slane %v1145_v18, %v704_v54 }
 0x207   :  { %v970_v40 = vpop.f32.mrf.mxu1 }
 0x208   :  { %v1042_v3 = vmax.f32 %v969_v46, 0.0  ;;  %v971_v5 = vadd.f32 %v970_v40, %v4132_v59 }
 0x209   :  { %1610 = vmatmul.mubr.bf16.gmra.mxu1 %v1067_v11  ;;  %1803 = vmatmul.mubr.bf16.gmra.mxu0 %v1067_v11  ;;  %v972_v19 = vpop.f32.mrf.mxu1 }
 0x20a   :  { %1619 = vmatprep.mubr.bf16.mxu1 %v1070_v13  ;;  %1812 = vmatprep.mubr.bf16.mxu0 %v1070_v13  ;;  %v973_v7 = vadd.f32 %v972_v19, %v4128_v57  ;;  %v1043_v6 = vmax.f32 %v971_v5, 0.0  ;;  %v1161_v13 = vsub.s32 3, %v4119_v47 }
 0x20b   :  { %v976_v35 = vpop.f32.mrf.mxu1 }
 0x20c   :  { %v1044_v31 = vmax.f32 %v973_v7, 0.0  ;;  %v1077_v32 = vpack.c.bf16 %v1043_v6, %v1041_v60  ;;  %v977_v11 = vadd.f32 %v976_v35, %v4132_v59  ;;  %v4255_v24 = vrot.slane %v1145_v18, %v1161_v13 }
 0x20d   :  { %v978_v44 = vpop.f32.mrf.mxu1 }
 0x20e   :  { %v979_v48 = vadd.f32 %v978_v44, %v4128_v57  ;;  %v1078_v58 = vpack.c.bf16 %v1044_v31, %v1042_v3 }
 0x20f   :  { %v980_v23 = vpop.f32.mrf.mxu1 }
 0x210   :  { %v1046_v8 = vmax.f32 %v979_v48, 0.0  ;;  %v981_v62 = vadd.f32 %v980_v23, %v4132_v59 }
 0x211   :  { %1620 = vmatmul.mubr.bf16.gmra.mxu1 %v1069_v55  ;;  %1813 = vmatmul.mubr.bf16.gmra.mxu0 %v1069_v55  ;;  %v982_v43 = vpop.f32.mrf.mxu1  ;;  %v4261_v55 = vrot.slane %v1145_v18, %v1157_v15 }
 0x212   :  { %1629 = vmatprep.mubr.bf16.mxu1 %v1072_v25  ;;  %1822 = vmatprep.mubr.bf16.mxu0 %v1072_v25  ;;  %v983_v52 = vadd.f32 %v982_v43, %v4128_v57  ;;  %v1045_v57 = vmax.f32 %v977_v11, 0.0  ;;  %v1047_v61 = vmax.f32 %v981_v62, 0.0 }
 0x214   :  { %v1048_v9 = vmax.f32 %v983_v52, 0.0  ;;  %v1079_v12 = vpack.c.bf16 %v1047_v61, %v1045_v57 }
 0x216   :  { %v1080_v2 = vpack.c.bf16 %v1048_v9, %v1046_v8 }
 0x219   :  { %1630 = vmatmul.mubr.bf16.gmra.mxu1 %v1071_v39  ;;  %1823 = vmatmul.mubr.bf16.gmra.mxu0 %v1071_v39 }
 0x21a   :  { %1639 = vmatprep.mubr.bf16.mxu1 %v1074_v34  ;;  %1832 = vmatprep.mubr.bf16.mxu0 %v1074_v34 }
 0x221   :  { %1640 = vmatmul.mubr.bf16.gmra.mxu1 %v1073_v45  ;;  %1833 = vmatmul.mubr.bf16.gmra.mxu0 %v1073_v45 }
 0x222   :  { %1649 = vmatprep.mubr.bf16.mxu1 %v1076_v56  ;;  %1842 = vmatprep.mubr.bf16.mxu0 %v1076_v56 }
 0x229   :  { %1650 = vmatmul.mubr.bf16.gmra.mxu1 %v1075_v4  ;;  %1843 = vmatmul.mubr.bf16.gmra.mxu0 %v1075_v4 }
 0x22a   :  { %1659 = vmatprep.mubr.bf16.mxu1 %v1078_v58  ;;  %1852 = vmatprep.mubr.bf16.mxu0 %v1078_v58 }
 0x231   :  { %1660 = vmatmul.mubr.bf16.gmra.mxu1 %v1077_v32  ;;  %1853 = vmatmul.mubr.bf16.gmra.mxu0 %v1077_v32 }
 0x232   :  { %1669 = vmatprep.mubr.bf16.mxu1 %v1080_v2  ;;  %1862 = vmatprep.mubr.bf16.mxu0 %v1080_v2 }
 0x239   :  { %1670 = vmatmul.mubr.bf16.gmra.mxu1 %v1079_v12  ;;  %1863 = vmatmul.mubr.bf16.gmra.mxu0 %v1079_v12 }
 0x281   :  { %v1521_v20 = vpop.f32.mrf.mxu1  ;;  %v1714_v59 = vpop.f32.mrf.mxu0 }
 0x282   :  { %v1522_v14 = vadd.f32 %v1521_v20, %v4259_v27  ;;  %v1715_v47 = vadd.f32 %v1714_v59, %v4261_v55 }
 0x283   :  { %v1523_v41 = vpop.f32.mrf.mxu1  ;;  %v1716_v16 = vpop.f32.mrf.mxu0 }
 0x284   :  { %v1524_v25 = vadd.f32 %v1523_v41, %v4253_v22  ;;  %v1717_v40 = vadd.f32 %v1716_v16, %v4255_v24  ;;  %v1873_v37 = vmax.f32 %v1522_v14, 0.0  ;;  %v1875_v38 = vmax.f32 %v1715_v47, 0.0 }
 0x285   :  { %v1525_v28 = vpop.f32.mrf.mxu1  ;;  %v1718_v17 = vpop.f32.mrf.mxu0 }
 0x286   :  { %v1526_v49 = vadd.f32 %v1525_v28, %v4259_v27  ;;  %v1719_v53 = vadd.f32 %v1718_v17, %v4261_v55  ;;  %v1874_v29 = vmax.f32 %v1524_v25, 0.0  ;;  %v1876_v34 = vmax.f32 %v1717_v40, 0.0 }
 0x287   :  { %v1527_v54 = vpop.f32.mrf.mxu1  ;;  %v1720_v50 = vpop.f32.mrf.mxu0 }
 0x288   :  { %v1528_v33 = vadd.f32 %v1527_v54, %v4253_v22  ;;  %v1721_v19 = vadd.f32 %v1720_v50, %v4255_v24  ;;  %v1877_v39 = vmax.f32 %v1526_v49, 0.0  ;;  %v1879_v10 = vmax.f32 %v1719_v53, 0.0 }
 0x289   :  { %v1531_v26 = vpop.f32.mrf.mxu1  ;;  %v1724_v21 = vpop.f32.mrf.mxu0 }
 0x28a   :  { %v1878_v35 = vmax.f32 %v1528_v33, 0.0  ;;  %v1880_v36 = vmax.f32 %v1721_v19, 0.0  ;;  %v2001_v42 = vpack.c.bf16 %v1877_v39, %v1873_v37  ;;  %v2003_v46 = vpack.c.bf16 %v1879_v10, %v1875_v38 }
 0x28b   :  { %v1533_v51 = vpop.f32.mrf.mxu1  ;;  %v1726_v44 = vpop.f32.mrf.mxu0  ;;  %v1532_v31 = vadd.f32 %v1531_v26, %v4259_v27  ;;  %v1725_v43 = vadd.f32 %v1724_v21, %v4261_v55 }
 0x28c   :  { %v2002_v45 = vpack.c.bf16 %v1878_v35, %v1874_v29  ;;  %v2004_v30 = vpack.c.bf16 %v1880_v36, %v1876_v34  ;;  %v1534_v7 = vadd.f32 %v1533_v51, %v4253_v22  ;;  %v1727_v0 = vadd.f32 %v1726_v44, %v4255_v24 }
 0x28d   :  { %v1535_v56 = vpop.f32.mrf.mxu1  ;;  %v1728_v23 = vpop.f32.mrf.mxu0  ;;  %v1881_v62 = vmax.f32 %v1532_v31, 0.0  ;;  %v1883_v2 = vmax.f32 %v1725_v43, 0.0 }
 0x28e   :  { %v1536_v1 = vadd.f32 %v1535_v56, %v4259_v27  ;;  %v1729_v3 = vadd.f32 %v1728_v23, %v4261_v55  ;;  %2360 = vmatprep.mubr.bf16.mxu1 %v2002_v45  ;;  %2521 = vmatprep.mubr.bf16.mxu0 %v2004_v30  ;;  %v1882_v8 = vmax.f32 %v1534_v7, 0.0  ;;  %v1884_v9 = vmax.f32 %v1727_v0, 0.0 }
 0x28f   :  { %v1537_v4 = vpop.f32.mrf.mxu1  ;;  %v1730_v63 = vpop.f32.mrf.mxu0  ;;  %2361 = vmatmul.mubr.bf16.vlgmr.msra.gmra.mxu1 %v2001_v42  ;;  %2522 = vmatmul.mubr.bf16.vlgmr.msra.gmra.mxu0 %v2003_v46 }
 0x290   :  { %v1538_v5 = vadd.f32 %v1537_v4, %v4253_v22  ;;  %v1731_v48 = vadd.f32 %v1730_v63, %v4255_v24  ;;  %v1885_v52 = vmax.f32 %v1536_v1, 0.0  ;;  %v1887_v58 = vmax.f32 %v1729_v3, 0.0 }
 0x291   :  { %v1541_v60 = vpop.f32.mrf.mxu1  ;;  %v1734_v6 = vpop.f32.mrf.mxu0 }
 0x292   :  { %v1886_v32 = vmax.f32 %v1538_v5, 0.0  ;;  %v1888_v11 = vmax.f32 %v1731_v48, 0.0  ;;  %v2005_v15 = vpack.c.bf16 %v1885_v52, %v1881_v62  ;;  %v2007_v18 = vpack.c.bf16 %v1887_v58, %v1883_v2 }
 0x293   :  { %v1543_v57 = vpop.f32.mrf.mxu1  ;;  %v1736_v61 = vpop.f32.mrf.mxu0  ;;  %v1542_v25 = vadd.f32 %v1541_v60, %v4259_v27  ;;  %v1735_v40 = vadd.f32 %v1734_v6, %v4261_v55 }
 0x294   :  { %v2006_v12 = vpack.c.bf16 %v1886_v32, %v1882_v8  ;;  %v2008_v13 = vpack.c.bf16 %v1888_v11, %v1884_v9  ;;  %v1544_v20 = vadd.f32 %v1543_v57, %v4253_v22  ;;  %v1737_v16 = vadd.f32 %v1736_v61, %v4255_v24 }
 0x295   :  { %v1545_v59 = vpop.f32.mrf.mxu1  ;;  %v1738_v41 = vpop.f32.mrf.mxu0  ;;  %v1889_v29 = vmax.f32 %v1542_v25, 0.0  ;;  %v1891_v34 = vmax.f32 %v1735_v40, 0.0 }
 0x296   :  { %v1546_v28 = vadd.f32 %v1545_v59, %v4259_v27  ;;  %v1739_v17 = vadd.f32 %v1738_v41, %v4261_v55  ;;  %2368 = vmatprep.mubr.bf16.mxu1 %v2006_v12  ;;  %2529 = vmatprep.mubr.bf16.mxu0 %v2008_v13  ;;  %v1890_v39 = vmax.f32 %v1544_v20, 0.0  ;;  %v1892_v10 = vmax.f32 %v1737_v16, 0.0 }
 0x297   :  { %v1547_v49 = vpop.f32.mrf.mxu1  ;;  %v1740_v53 = vpop.f32.mrf.mxu0  ;;  %2369 = vmatmul.mubr.bf16.gmra.mxu1 %v2005_v15  ;;  %2530 = vmatmul.mubr.bf16.gmra.mxu0 %v2007_v18 }
 0x298   :  { %v1548_v14 = vadd.f32 %v1547_v49, %v4253_v22  ;;  %v1741_v47 = vadd.f32 %v1740_v53, %v4255_v24  ;;  %v1893_v54 = vmax.f32 %v1546_v28, 0.0  ;;  %v1895_v50 = vmax.f32 %v1739_v17, 0.0 }
 0x299   :  { %v1551_v33 = vpop.f32.mrf.mxu1  ;;  %v1744_v19 = vpop.f32.mrf.mxu0 }
 0x29a   :  { %v1894_v26 = vmax.f32 %v1548_v14, 0.0  ;;  %v1896_v21 = vmax.f32 %v1741_v47, 0.0  ;;  %v2009_v51 = vpack.c.bf16 %v1893_v54, %v1889_v29  ;;  %v2011_v44 = vpack.c.bf16 %v1895_v50, %v1891_v34 }
 0x29b   :  { %v1553_v35 = vpop.f32.mrf.mxu1  ;;  %v1746_v36 = vpop.f32.mrf.mxu0  ;;  %v1552_v23 = vadd.f32 %v1551_v33, %v4259_v27  ;;  %v1745_v0 = vadd.f32 %v1744_v19, %v4261_v55 }
 0x29c   :  { %v2010_v37 = vpack.c.bf16 %v1894_v26, %v1890_v39  ;;  %v2012_v38 = vpack.c.bf16 %v1896_v21, %v1892_v10  ;;  %v1554_v45 = vadd.f32 %v1553_v35, %v4253_v22  ;;  %v1747_v46 = vadd.f32 %v1746_v36, %v4255_v24 }
 0x29d   :  { %v1555_v30 = vpop.f32.mrf.mxu1  ;;  %v1748_v42 = vpop.f32.mrf.mxu0  ;;  %v1897_v8 = vmax.f32 %v1552_v23, 0.0  ;;  %v1899_v9 = vmax.f32 %v1745_v0, 0.0 }
 0x29e   :  { %v1556_v7 = vadd.f32 %v1555_v30, %v4259_v27  ;;  %v1749_v56 = vadd.f32 %v1748_v42, %v4261_v55  ;;  %2376 = vmatprep.mubr.bf16.mxu1 %v2010_v37  ;;  %2537 = vmatprep.mubr.bf16.mxu0 %v2012_v38  ;;  %v1898_v52 = vmax.f32 %v1554_v45, 0.0  ;;  %v1900_v58 = vmax.f32 %v1747_v46, 0.0 }
 0x29f   :  { %v1557_v1 = vpop.f32.mrf.mxu1  ;;  %v1750_v3 = vpop.f32.mrf.mxu0  ;;  %2377 = vmatmul.mubr.bf16.gmra.mxu1 %v2009_v51  ;;  %2538 = vmatmul.mubr.bf16.gmra.mxu0 %v2011_v44 }
 0x2a0   :  { %v1558_v31 = vadd.f32 %v1557_v1, %v4253_v22  ;;  %v1751_v43 = vadd.f32 %v1750_v3, %v4255_v24  ;;  %v1901_v4 = vmax.f32 %v1556_v7, 0.0  ;;  %v1903_v63 = vmax.f32 %v1749_v56, 0.0 }
 0x2a1   :  { %v1561_v5 = vpop.f32.mrf.mxu1  ;;  %v1754_v48 = vpop.f32.mrf.mxu0 }
 0x2a2   :  { %v1902_v60 = vmax.f32 %v1558_v31, 0.0  ;;  %v1904_v6 = vmax.f32 %v1751_v43, 0.0  ;;  %v2013_v57 = vpack.c.bf16 %v1901_v4, %v1897_v8  ;;  %v2015_v61 = vpack.c.bf16 %v1903_v63, %v1899_v9 }
 0x2a3   :  { %v1563_v32 = vpop.f32.mrf.mxu1  ;;  %v1756_v11 = vpop.f32.mrf.mxu0  ;;  %v1562_v41 = vadd.f32 %v1561_v5, %v4259_v27  ;;  %v1755_v16 = vadd.f32 %v1754_v48, %v4261_v55 }
 0x2a4   :  { %v2014_v62 = vpack.c.bf16 %v1902_v60, %v1898_v52  ;;  %v2016_v2 = vpack.c.bf16 %v1904_v6, %v1900_v58  ;;  %v1564_v12 = vadd.f32 %v1563_v32, %v4253_v22  ;;  %v1757_v18 = vadd.f32 %v1756_v11, %v4255_v24 }
 0x2a5   :  { %v1565_v13 = vpop.f32.mrf.mxu1  ;;  %v1758_v15 = vpop.f32.mrf.mxu0  ;;  %v1905_v39 = vmax.f32 %v1562_v41, 0.0  ;;  %v1907_v10 = vmax.f32 %v1755_v16, 0.0 }
 0x2a6   :  { %v1566_v20 = vadd.f32 %v1565_v13, %v4259_v27  ;;  %v1759_v59 = vadd.f32 %v1758_v15, %v4261_v55  ;;  %2384 = vmatprep.mubr.bf16.mxu1 %v2014_v62  ;;  %2545 = vmatprep.mubr.bf16.mxu0 %v2016_v2  ;;  %v1906_v54 = vmax.f32 %v1564_v12, 0.0  ;;  %v1908_v50 = vmax.f32 %v1757_v18, 0.0 }
 0x2a7   :  { %v1567_v28 = vpop.f32.mrf.mxu1  ;;  %v1760_v17 = vpop.f32.mrf.mxu0  ;;  %2385 = vmatmul.mubr.bf16.gmra.mxu1 %v2013_v57  ;;  %2546 = vmatmul.mubr.bf16.gmra.mxu0 %v2015_v61 }
 0x2a8   :  { %v1568_v25 = vadd.f32 %v1567_v28, %v4253_v22  ;;  %v1761_v40 = vadd.f32 %v1760_v17, %v4255_v24  ;;  %v1909_v49 = vmax.f32 %v1566_v20, 0.0  ;;  %v1911_v53 = vmax.f32 %v1759_v59, 0.0 }
 0x2a9   :  { %v1571_v14 = vpop.f32.mrf.mxu1  ;;  %v1764_v47 = vpop.f32.mrf.mxu0 }
 0x2aa   :  { %v1910_v33 = vmax.f32 %v1568_v25, 0.0  ;;  %v1912_v19 = vmax.f32 %v1761_v40, 0.0  ;;  %v2017_v35 = vpack.c.bf16 %v1909_v49, %v1905_v39  ;;  %v2019_v36 = vpack.c.bf16 %v1911_v53, %v1907_v10 }
 0x2ab   :  { %v1573_v26 = vpop.f32.mrf.mxu1  ;;  %v1766_v21 = vpop.f32.mrf.mxu0  ;;  %v1572_v42 = vadd.f32 %v1571_v14, %v4259_v27  ;;  %v1765_v46 = vadd.f32 %v1764_v47, %v4261_v55 }
 0x2ac   :  { %v2018_v29 = vpack.c.bf16 %v1910_v33, %v1906_v54  ;;  %v2020_v34 = vpack.c.bf16 %v1912_v19, %v1908_v50  ;;  %v1574_v37 = vadd.f32 %v1573_v26, %v4253_v22  ;;  %v1767_v44 = vadd.f32 %v1766_v21, %v4255_v24 }
 0x2ad   :  { %v1575_v38 = vpop.f32.mrf.mxu1  ;;  %v1768_v51 = vpop.f32.mrf.mxu0  ;;  %v1913_v52 = vmax.f32 %v1572_v42, 0.0  ;;  %v1915_v58 = vmax.f32 %v1765_v46, 0.0 }
 0x2ae   :  { %v1576_v45 = vadd.f32 %v1575_v38, %v4259_v27  ;;  %v1769_v30 = vadd.f32 %v1768_v51, %v4261_v55  ;;  %2392 = vmatprep.mubr.bf16.mxu1 %v2018_v29  ;;  %2553 = vmatprep.mubr.bf16.mxu0 %v2020_v34  ;;  %v1914_v4 = vmax.f32 %v1574_v37, 0.0  ;;  %v1916_v63 = vmax.f32 %v1767_v44, 0.0 }
 0x2af   :  { %v1577_v7 = vpop.f32.mrf.mxu1  ;;  %v1770_v56 = vpop.f32.mrf.mxu0  ;;  %2393 = vmatmul.mubr.bf16.gmra.mxu1 %v2017_v35  ;;  %2554 = vmatmul.mubr.bf16.gmra.mxu0 %v2019_v36 }
 0x2b0   :  { %v1578_v23 = vadd.f32 %v1577_v7, %v4253_v22  ;;  %v1771_v0 = vadd.f32 %v1770_v56, %v4255_v24  ;;  %v1917_v1 = vmax.f32 %v1576_v45, 0.0  ;;  %v1919_v3 = vmax.f32 %v1769_v30, 0.0 }
 0x2b1   :  { %v1581_v31 = vpop.f32.mrf.mxu1  ;;  %v1774_v43 = vpop.f32.mrf.mxu0 }
 0x2b2   :  { %v1918_v5 = vmax.f32 %v1578_v23, 0.0  ;;  %v1920_v48 = vmax.f32 %v1771_v0, 0.0  ;;  %v2021_v32 = vpack.c.bf16 %v1917_v1, %v1913_v52  ;;  %v2023_v11 = vpack.c.bf16 %v1919_v3, %v1915_v58 }
 0x2b3   :  { %v1583_v60 = vpop.f32.mrf.mxu1  ;;  %v1776_v6 = vpop.f32.mrf.mxu0  ;;  %v1582_v15 = vadd.f32 %v1581_v31, %v4259_v27  ;;  %v1775_v18 = vadd.f32 %v1774_v43, %v4261_v55 }
 0x2b4   :  { %v2022_v8 = vpack.c.bf16 %v1918_v5, %v1914_v4  ;;  %v2024_v9 = vpack.c.bf16 %v1920_v48, %v1916_v63  ;;  %v1584_v62 = vadd.f32 %v1583_v60, %v4253_v22  ;;  %v1777_v61 = vadd.f32 %v1776_v6, %v4255_v24 }
 0x2b5   :  { %v1585_v2 = vpop.f32.mrf.mxu1  ;;  %v1778_v57 = vpop.f32.mrf.mxu0  ;;  %v1921_v54 = vmax.f32 %v1582_v15, 0.0  ;;  %v1923_v50 = vmax.f32 %v1775_v18, 0.0 }
 0x2b6   :  { %v1586_v12 = vadd.f32 %v1585_v2, %v4259_v27  ;;  %v1779_v13 = vadd.f32 %v1778_v57, %v4261_v55  ;;  %2400 = vmatprep.mubr.bf16.mxu1 %v2022_v8  ;;  %2561 = vmatprep.mubr.bf16.mxu0 %v2024_v9  ;;  %v1922_v49 = vmax.f32 %v1584_v62, 0.0  ;;  %v1924_v53 = vmax.f32 %v1777_v61, 0.0 }
 0x2b7   :  { %v1587_v20 = vpop.f32.mrf.mxu1  ;;  %v1780_v59 = vpop.f32.mrf.mxu0  ;;  %2401 = vmatmul.mubr.bf16.gmra.mxu1 %v2021_v32  ;;  %2562 = vmatmul.mubr.bf16.gmra.mxu0 %v2023_v11 }
 0x2b8   :  { %v1588_v41 = vadd.f32 %v1587_v20, %v4253_v22  ;;  %v1781_v16 = vadd.f32 %v1780_v59, %v4255_v24  ;;  %v1925_v28 = vmax.f32 %v1586_v12, 0.0  ;;  %v1927_v17 = vmax.f32 %v1779_v13, 0.0 }
 0x2b9   :  { %v1591_v25 = vpop.f32.mrf.mxu1  ;;  %v1784_v40 = vpop.f32.mrf.mxu0 }
 0x2ba   :  { %v1926_v14 = vmax.f32 %v1588_v41, 0.0  ;;  %v1928_v47 = vmax.f32 %v1781_v16, 0.0  ;;  %v2025_v26 = vpack.c.bf16 %v1925_v28, %v1921_v54  ;;  %v2027_v21 = vpack.c.bf16 %v1927_v17, %v1923_v50 }
 0x2bb   :  { %v1593_v33 = vpop.f32.mrf.mxu1  ;;  %v1786_v19 = vpop.f32.mrf.mxu0  ;;  %v1592_v51 = vadd.f32 %v1591_v25, %v4259_v27  ;;  %v1785_v44 = vadd.f32 %v1784_v40, %v4261_v55 }
 0x2bc   :  { %v2026_v39 = vpack.c.bf16 %v1926_v14, %v1922_v49  ;;  %v2028_v10 = vpack.c.bf16 %v1928_v47, %v1924_v53  ;;  %v1594_v29 = vadd.f32 %v1593_v33, %v4253_v22  ;;  %v1787_v36 = vadd.f32 %v1786_v19, %v4255_v24 }
 0x2bd   :  { %v1595_v34 = vpop.f32.mrf.mxu1  ;;  %v1788_v35 = vpop.f32.mrf.mxu0  ;;  %v1929_v4 = vmax.f32 %v1592_v51, 0.0  ;;  %v1931_v63 = vmax.f32 %v1785_v44, 0.0 }
 0x2be   :  { %v1596_v37 = vadd.f32 %v1595_v34, %v4259_v27  ;;  %v1789_v38 = vadd.f32 %v1788_v35, %v4261_v55  ;;  %2408 = vmatprep.mubr.bf16.mxu1 %v2026_v39  ;;  %2569 = vmatprep.mubr.bf16.mxu0 %v2028_v10  ;;  %v1930_v1 = vmax.f32 %v1594_v29, 0.0  ;;  %v1932_v3 = vmax.f32 %v1787_v36, 0.0 }
 0x2bf   :  { %v1597_v45 = vpop.f32.mrf.mxu1  ;;  %v1790_v30 = vpop.f32.mrf.mxu0  ;;  %2409 = vmatmul.mubr.bf16.gmra.mxu1 %v2025_v26  ;;  %2570 = vmatmul.mubr.bf16.gmra.mxu0 %v2027_v21 }
 0x2c0   :  { %v1598_v42 = vadd.f32 %v1597_v45, %v4253_v22  ;;  %v1791_v46 = vadd.f32 %v1790_v30, %v4255_v24  ;;  %v1933_v7 = vmax.f32 %v1596_v37, 0.0  ;;  %v1935_v56 = vmax.f32 %v1789_v38, 0.0 }
 0x2c1   :  { %v1601_v23 = vpop.f32.mrf.mxu1  ;;  %v1794_v0 = vpop.f32.mrf.mxu0 }
 0x2c2   :  { %v1934_v31 = vmax.f32 %v1598_v42, 0.0  ;;  %v1936_v43 = vmax.f32 %v1791_v46, 0.0  ;;  %v2029_v60 = vpack.c.bf16 %v1933_v7, %v1929_v4  ;;  %v2031_v6 = vpack.c.bf16 %v1935_v56, %v1931_v63 }
 0x2c3   :  { %v1603_v5 = vpop.f32.mrf.mxu1  ;;  %v1796_v48 = vpop.f32.mrf.mxu0  ;;  %v1602_v57 = vadd.f32 %v1601_v23, %v4259_v27  ;;  %v1795_v61 = vadd.f32 %v1794_v0, %v4261_v55 }
 0x2c4   :  { %v2030_v52 = vpack.c.bf16 %v1934_v31, %v1930_v1  ;;  %v2032_v58 = vpack.c.bf16 %v1936_v43, %v1932_v3  ;;  %v1604_v8 = vadd.f32 %v1603_v5, %v4253_v22  ;;  %v1797_v11 = vadd.f32 %v1796_v48, %v4255_v24 }
 0x2c5   :  { %v1605_v9 = vpop.f32.mrf.mxu1  ;;  %v1798_v32 = vpop.f32.mrf.mxu0  ;;  %v1937_v49 = vmax.f32 %v1602_v57, 0.0  ;;  %v1939_v53 = vmax.f32 %v1795_v61, 0.0 }
 0x2c6   :  { %v1606_v62 = vadd.f32 %v1605_v9, %v4259_v27  ;;  %v1799_v2 = vadd.f32 %v1798_v32, %v4261_v55  ;;  %2416 = vmatprep.mubr.bf16.mxu1 %v2030_v52  ;;  %2577 = vmatprep.mubr.bf16.mxu0 %v2032_v58  ;;  %v1938_v28 = vmax.f32 %v1604_v8, 0.0  ;;  %v1940_v17 = vmax.f32 %v1797_v11, 0.0 }
 0x2c7   :  { %v1607_v12 = vpop.f32.mrf.mxu1  ;;  %v1800_v13 = vpop.f32.mrf.mxu0  ;;  %2417 = vmatmul.mubr.bf16.gmra.mxu1 %v2029_v60  ;;  %2578 = vmatmul.mubr.bf16.gmra.mxu0 %v2031_v6 }
 0x2c8   :  { %v1608_v15 = vadd.f32 %v1607_v12, %v4253_v22  ;;  %v1801_v18 = vadd.f32 %v1800_v13, %v4255_v24  ;;  %v1941_v20 = vmax.f32 %v1606_v62, 0.0  ;;  %v1943_v59 = vmax.f32 %v1799_v2, 0.0 }
 0x2c9   :  { %v1611_v41 = vpop.f32.mrf.mxu1  ;;  %v1804_v16 = vpop.f32.mrf.mxu0 }
 0x2ca   :  { %v1942_v25 = vmax.f32 %v1608_v15, 0.0  ;;  %v1944_v40 = vmax.f32 %v1801_v18, 0.0  ;;  %v2033_v33 = vpack.c.bf16 %v1941_v20, %v1937_v49  ;;  %v2035_v19 = vpack.c.bf16 %v1943_v59, %v1939_v53 }
 0x2cb   :  { %v1613_v14 = vpop.f32.mrf.mxu1  ;;  %v1806_v47 = vpop.f32.mrf.mxu0  ;;  %v1612_v35 = vadd.f32 %v1611_v41, %v4259_v27  ;;  %v1805_v36 = vadd.f32 %v1804_v16, %v4261_v55 }
 0x2cc   :  { %v2034_v54 = vpack.c.bf16 %v1942_v25, %v1938_v28  ;;  %v2036_v50 = vpack.c.bf16 %v1944_v40, %v1940_v17  ;;  %v1614_v39 = vadd.f32 %v1613_v14, %v4253_v22  ;;  %v1807_v21 = vadd.f32 %v1806_v47, %v4255_v24 }
 0x2cd   :  { %v1615_v10 = vpop.f32.mrf.mxu1  ;;  %v1808_v26 = vpop.f32.mrf.mxu0  ;;  %v1945_v1 = vmax.f32 %v1612_v35, 0.0  ;;  %v1947_v3 = vmax.f32 %v1805_v36, 0.0 }
 0x2ce   :  { %v1616_v29 = vadd.f32 %v1615_v10, %v4259_v27  ;;  %v1809_v34 = vadd.f32 %v1808_v26, %v4261_v55  ;;  %2424 = vmatprep.mubr.bf16.mxu1 %v2034_v54  ;;  %2585 = vmatprep.mubr.bf16.mxu0 %v2036_v50  ;;  %v1946_v7 = vmax.f32 %v1614_v39, 0.0  ;;  %v1948_v56 = vmax.f32 %v1807_v21, 0.0 }
 0x2cf   :  { %v1617_v37 = vpop.f32.mrf.mxu1  ;;  %v1810_v38 = vpop.f32.mrf.mxu0  ;;  %2425 = vmatmul.mubr.bf16.gmra.mxu1 %v2033_v33  ;;  %2586 = vmatmul.mubr.bf16.gmra.mxu0 %v2035_v19 }
 0x2d0   :  { %v1618_v51 = vadd.f32 %v1617_v37, %v4253_v22  ;;  %v1811_v44 = vadd.f32 %v1810_v38, %v4255_v24  ;;  %v1949_v45 = vmax.f32 %v1616_v29, 0.0  ;;  %v1951_v30 = vmax.f32 %v1809_v34, 0.0 }
 0x2d1   :  { %v1621_v42 = vpop.f32.mrf.mxu1  ;;  %v1814_v46 = vpop.f32.mrf.mxu0 }
 0x2d2   :  { %v1950_v23 = vmax.f32 %v1618_v51, 0.0  ;;  %v1952_v0 = vmax.f32 %v1811_v44, 0.0  ;;  %v2037_v5 = vpack.c.bf16 %v1949_v45, %v1945_v1  ;;  %v2039_v48 = vpack.c.bf16 %v1951_v30, %v1947_v3 }
 0x2d3   :  { %v1623_v31 = vpop.f32.mrf.mxu1  ;;  %v1816_v43 = vpop.f32.mrf.mxu0  ;;  %v1622_v32 = vadd.f32 %v1621_v42, %v4259_v27  ;;  %v1815_v11 = vadd.f32 %v1814_v46, %v4261_v55 }
 0x2d4   :  { %v2038_v4 = vpack.c.bf16 %v1950_v23, %v1946_v7  ;;  %v2040_v63 = vpack.c.bf16 %v1952_v0, %v1948_v56  ;;  %v1624_v52 = vadd.f32 %v1623_v31, %v4253_v22  ;;  %v1817_v6 = vadd.f32 %v1816_v43, %v4255_v24 }
 0x2d5   :  { %v1625_v58 = vpop.f32.mrf.mxu1  ;;  %v1818_v60 = vpop.f32.mrf.mxu0  ;;  %v1953_v28 = vmax.f32 %v1622_v32, 0.0  ;;  %v1955_v17 = vmax.f32 %v1815_v11, 0.0 }
 0x2d6   :  { %v1626_v8 = vadd.f32 %v1625_v58, %v4259_v27  ;;  %v1819_v9 = vadd.f32 %v1818_v60, %v4261_v55  ;;  %2432 = vmatprep.mubr.bf16.mxu1 %v2038_v4  ;;  %2593 = vmatprep.mubr.bf16.mxu0 %v2040_v63  ;;  %v1954_v20 = vmax.f32 %v1624_v52, 0.0  ;;  %v1956_v59 = vmax.f32 %v1817_v6, 0.0 }
 0x2d7   :  { %v1627_v62 = vpop.f32.mrf.mxu1  ;;  %v1820_v2 = vpop.f32.mrf.mxu0  ;;  %2433 = vmatmul.mubr.bf16.gmra.mxu1 %v2037_v5  ;;  %2594 = vmatmul.mubr.bf16.gmra.mxu0 %v2039_v48 }
 0x2d8   :  { %v1628_v57 = vadd.f32 %v1627_v62, %v4253_v22  ;;  %v1821_v61 = vadd.f32 %v1820_v2, %v4255_v24  ;;  %v1957_v12 = vmax.f32 %v1626_v8, 0.0  ;;  %v1959_v13 = vmax.f32 %v1819_v9, 0.0 }
 0x2d9   :  { %v1631_v15 = vpop.f32.mrf.mxu1  ;;  %v1824_v18 = vpop.f32.mrf.mxu0 }
 0x2da   :  { %v1958_v41 = vmax.f32 %v1628_v57, 0.0  ;;  %v1960_v16 = vmax.f32 %v1821_v61, 0.0  ;;  %v2041_v14 = vpack.c.bf16 %v1957_v12, %v1953_v28  ;;  %v2043_v47 = vpack.c.bf16 %v1959_v13, %v1955_v17 }
 0x2db   :  { %v1633_v25 = vpop.f32.mrf.mxu1  ;;  %v1826_v40 = vpop.f32.mrf.mxu0  ;;  %v1632_v26 = vadd.f32 %v1631_v15, %v4259_v27  ;;  %v1825_v21 = vadd.f32 %v1824_v18, %v4261_v55 }
 0x2dc   :  { %v2042_v49 = vpack.c.bf16 %v1958_v41, %v1954_v20  ;;  %v2044_v53 = vpack.c.bf16 %v1960_v16, %v1956_v59  ;;  %v1634_v54 = vadd.f32 %v1633_v25, %v4253_v22  ;;  %v1827_v19 = vadd.f32 %v1826_v40, %v4255_v24 }
 0x2dd   :  { %v1635_v50 = vpop.f32.mrf.mxu1  ;;  %v1828_v33 = vpop.f32.mrf.mxu0  ;;  %v1961_v7 = vmax.f32 %v1632_v26, 0.0  ;;  %v1963_v56 = vmax.f32 %v1825_v21, 0.0 }
 0x2de   :  { %v1636_v39 = vadd.f32 %v1635_v50, %v4259_v27  ;;  %v1829_v10 = vadd.f32 %v1828_v33, %v4261_v55  ;;  %2440 = vmatprep.mubr.bf16.mxu1 %v2042_v49  ;;  %2601 = vmatprep.mubr.bf16.mxu0 %v2044_v53  ;;  %v1962_v45 = vmax.f32 %v1634_v54, 0.0  ;;  %v1964_v30 = vmax.f32 %v1827_v19, 0.0 }
 0x2df   :  { %v1637_v29 = vpop.f32.mrf.mxu1  ;;  %v1830_v34 = vpop.f32.mrf.mxu0  ;;  %2441 = vmatmul.mubr.bf16.gmra.mxu1 %v2041_v14  ;;  %2602 = vmatmul.mubr.bf16.gmra.mxu0 %v2043_v47 }
 0x2e0   :  { %v1638_v35 = vadd.f32 %v1637_v29, %v4253_v22  ;;  %v1831_v36 = vadd.f32 %v1830_v34, %v4255_v24  ;;  %v1965_v37 = vmax.f32 %v1636_v39, 0.0  ;;  %v1967_v38 = vmax.f32 %v1829_v10, 0.0 }
 0x2e1   :  { %v1641_v51 = vpop.f32.mrf.mxu1  ;;  %v1834_v44 = vpop.f32.mrf.mxu0 }
 0x2e2   :  { %v1966_v42 = vmax.f32 %v1638_v35, 0.0  ;;  %v1968_v46 = vmax.f32 %v1831_v36, 0.0  ;;  %v2045_v31 = vpack.c.bf16 %v1965_v37, %v1961_v7  ;;  %v2047_v43 = vpack.c.bf16 %v1967_v38, %v1963_v56 }
 0x2e3   :  { %v1643_v23 = vpop.f32.mrf.mxu1  ;;  %v1836_v0 = vpop.f32.mrf.mxu0  ;;  %v1642_v60 = vadd.f32 %v1641_v51, %v4259_v27  ;;  %v1835_v6 = vadd.f32 %v1834_v44, %v4261_v55 }
 0x2e4   :  { %v2046_v1 = vpack.c.bf16 %v1966_v42, %v1962_v45  ;;  %v2048_v3 = vpack.c.bf16 %v1968_v46, %v1964_v30  ;;  %v1644_v4 = vadd.f32 %v1643_v23, %v4253_v22  ;;  %v1837_v48 = vadd.f32 %v1836_v0, %v4255_v24 }
 0x2e5   :  { %v1645_v63 = vpop.f32.mrf.mxu1  ;;  %v1838_v5 = vpop.f32.mrf.mxu0  ;;  %v1969_v20 = vmax.f32 %v1642_v60, 0.0  ;;  %v1971_v59 = vmax.f32 %v1835_v6, 0.0 }
 0x2e6   :  { %v1646_v52 = vadd.f32 %v1645_v63, %v4259_v27  ;;  %v1839_v58 = vadd.f32 %v1838_v5, %v4261_v55  ;;  %2448 = vmatprep.mubr.bf16.mxu1 %v2046_v1  ;;  %2609 = vmatprep.mubr.bf16.mxu0 %v2048_v3  ;;  %v1970_v12 = vmax.f32 %v1644_v4, 0.0  ;;  %v1972_v13 = vmax.f32 %v1837_v48, 0.0 }
 0x2e7   :  { %v1647_v8 = vpop.f32.mrf.mxu1  ;;  %v1840_v9 = vpop.f32.mrf.mxu0  ;;  %2449 = vmatmul.mubr.bf16.gmra.mxu1 %v2045_v31  ;;  %2610 = vmatmul.mubr.bf16.gmra.mxu0 %v2047_v43 }
 0x2e8   :  { %v1648_v32 = vadd.f32 %v1647_v8, %v4253_v22  ;;  %v1841_v11 = vadd.f32 %v1840_v9, %v4255_v24  ;;  %v1973_v62 = vmax.f32 %v1646_v52, 0.0  ;;  %v1975_v2 = vmax.f32 %v1839_v58, 0.0 }
 0x2e9   :  { %v1651_v57 = vpop.f32.mrf.mxu1  ;;  %v1844_v61 = vpop.f32.mrf.mxu0 }
 0x2ea   :  { %v1974_v15 = vmax.f32 %v1648_v32, 0.0  ;;  %v1976_v18 = vmax.f32 %v1841_v11, 0.0  ;;  %v2049_v25 = vpack.c.bf16 %v1973_v62, %v1969_v20  ;;  %v2051_v40 = vpack.c.bf16 %v1975_v2, %v1971_v59 }
 0x2eb   :  { %v1653_v41 = vpop.f32.mrf.mxu1  ;;  %v1846_v16 = vpop.f32.mrf.mxu0  ;;  %v1652_v33 = vadd.f32 %v1651_v57, %v4259_v27  ;;  %v1845_v19 = vadd.f32 %v1844_v61, %v4261_v55 }
 0x2ec   :  { %v2050_v28 = vpack.c.bf16 %v1974_v15, %v1970_v12  ;;  %v2052_v17 = vpack.c.bf16 %v1976_v18, %v1972_v13  ;;  %v1654_v49 = vadd.f32 %v1653_v41, %v4253_v22  ;;  %v1847_v47 = vadd.f32 %v1846_v16, %v4255_v24 }
 0x2ed   :  { %v1655_v53 = vpop.f32.mrf.mxu1  ;;  %v1848_v14 = vpop.f32.mrf.mxu0  ;;  %v1977_v45 = vmax.f32 %v1652_v33, 0.0  ;;  %v1979_v30 = vmax.f32 %v1845_v19, 0.0 }
 0x2ee   :  { %v1656_v54 = vadd.f32 %v1655_v53, %v4259_v27  ;;  %v1849_v50 = vadd.f32 %v1848_v14, %v4261_v55  ;;  %2456 = vmatprep.mubr.bf16.mxu1 %v2050_v28  ;;  %2617 = vmatprep.mubr.bf16.mxu0 %v2052_v17  ;;  %v1978_v37 = vmax.f32 %v1654_v49, 0.0  ;;  %v1980_v38 = vmax.f32 %v1847_v47, 0.0 }
 0x2ef   :  { %v1657_v39 = vpop.f32.mrf.mxu1  ;;  %v1850_v10 = vpop.f32.mrf.mxu0  ;;  %2457 = vmatmul.mubr.bf16.gmra.mxu1 %v2049_v25  ;;  %2618 = vmatmul.mubr.bf16.gmra.mxu0 %v2051_v40 }
 0x2f0   :  { %v1658_v26 = vadd.f32 %v1657_v39, %v4253_v22  ;;  %v1851_v21 = vadd.f32 %v1850_v10, %v4255_v24  ;;  %v1981_v29 = vmax.f32 %v1656_v54, 0.0  ;;  %v1983_v34 = vmax.f32 %v1849_v50, 0.0 }
 0x2f1   :  { %v1661_v35 = vpop.f32.mrf.mxu1  ;;  %v1854_v36 = vpop.f32.mrf.mxu0 }
 0x2f2   :  { %v1982_v51 = vmax.f32 %v1658_v26, 0.0  ;;  %v1984_v44 = vmax.f32 %v1851_v21, 0.0  ;;  %v2053_v23 = vpack.c.bf16 %v1981_v29, %v1977_v45  ;;  %v2055_v0 = vpack.c.bf16 %v1983_v34, %v1979_v30 }
 0x2f3   :  { %v1663_v42 = vpop.f32.mrf.mxu1  ;;  %v1856_v46 = vpop.f32.mrf.mxu0  ;;  %v1662_v5 = vadd.f32 %v1661_v35, %v4259_v27  ;;  %v1855_v48 = vadd.f32 %v1854_v36, %v4261_v55 }
 0x2f4   :  { %v2054_v7 = vpack.c.bf16 %v1982_v51, %v1978_v37  ;;  %v2056_v56 = vpack.c.bf16 %v1984_v44, %v1980_v38  ;;  %v1664_v1 = vadd.f32 %v1663_v42, %v4253_v22  ;;  %v1857_v43 = vadd.f32 %v1856_v46, %v4255_v24 }
 0x2f5   :  { %v1665_v3 = vpop.f32.mrf.mxu1  ;;  %v1858_v31 = vpop.f32.mrf.mxu0  ;;  %v1985_v12 = vmax.f32 %v1662_v5, 0.0  ;;  %v1987_v13 = vmax.f32 %v1855_v48, 0.0 }
 0x2f6   :  { %v1666_v4 = vadd.f32 %v1665_v3, %v4259_v27  ;;  %v1859_v63 = vadd.f32 %v1858_v31, %v4261_v55  ;;  %2464 = vmatprep.mubr.bf16.mxu1 %v2054_v7  ;;  %2625 = vmatprep.mubr.bf16.mxu0 %v2056_v56  ;;  %v1986_v62 = vmax.f32 %v1664_v1, 0.0  ;;  %v1988_v2 = vmax.f32 %v1857_v43, 0.0 }
 0x2f7   :  { %v1667_v52 = vpop.f32.mrf.mxu1  ;;  %v1860_v58 = vpop.f32.mrf.mxu0  ;;  %2465 = vmatmul.mubr.bf16.gmra.mxu1 %v2053_v23  ;;  %2626 = vmatmul.mubr.bf16.gmra.mxu0 %v2055_v0 }
 0x2f8   :  { %v1668_v60 = vadd.f32 %v1667_v52, %v4253_v22  ;;  %v1861_v6 = vadd.f32 %v1860_v58, %v4255_v24  ;;  %v1989_v8 = vmax.f32 %v1666_v4, 0.0  ;;  %v1991_v9 = vmax.f32 %v1859_v63, 0.0 }
 0x2f9   :  { %v1671_v32 = vpop.f32.mrf.mxu1  ;;  %v1864_v11 = vpop.f32.mrf.mxu0 }
 0x2fa   :  { %v1990_v57 = vmax.f32 %v1668_v60, 0.0  ;;  %v1992_v61 = vmax.f32 %v1861_v6, 0.0  ;;  %v2057_v41 = vpack.c.bf16 %v1989_v8, %v1985_v12  ;;  %v2059_v16 = vpack.c.bf16 %v1991_v9, %v1987_v13 }
 0x2fb   :  { %v1673_v15 = vpop.f32.mrf.mxu1  ;;  %v1866_v18 = vpop.f32.mrf.mxu0  ;;  %v1672_v14 = vadd.f32 %v1671_v32, %v4259_v27  ;;  %v1865_v47 = vadd.f32 %v1864_v11, %v4261_v55 }
 0x2fc   :  { %v2058_v20 = vpack.c.bf16 %v1990_v57, %v1986_v62  ;;  %v2060_v59 = vpack.c.bf16 %v1992_v61, %v1988_v2  ;;  %v1674_v28 = vadd.f32 %v1673_v15, %v4253_v22  ;;  %v1867_v40 = vadd.f32 %v1866_v18, %v4255_v24 }
 0x2fd   :  { %v1675_v17 = vpop.f32.mrf.mxu1  ;;  %v1868_v25 = vpop.f32.mrf.mxu0  ;;  %v1993_v35 = vmax.f32 %v1672_v14, 0.0  ;;  %v1995_v36 = vmax.f32 %v1865_v47, 0.0 }
 0x2fe   :  { %v1676_v49 = vadd.f32 %v1675_v17, %v4259_v27  ;;  %v1869_v53 = vadd.f32 %v1868_v25, %v4261_v55  ;;  %2472 = vmatprep.mubr.bf16.mxu1 %v2058_v20  ;;  %2633 = vmatprep.mubr.bf16.mxu0 %v2060_v59  ;;  %v1994_v26 = vmax.f32 %v1674_v28, 0.0  ;;  %v1996_v21 = vmax.f32 %v1867_v40, 0.0 }
 0x2ff   :  { %v1677_v54 = vpop.f32.mrf.mxu1  ;;  %v1870_v50 = vpop.f32.mrf.mxu0  ;;  %2473 = vmatmul.mubr.bf16.gmra.mxu1 %v2057_v41  ;;  %2634 = vmatmul.mubr.bf16.gmra.mxu0 %v2059_v16 }
 0x300   :  { %v1678_v33 = vadd.f32 %v1677_v54, %v4253_v22  ;;  %v1871_v19 = vadd.f32 %v1870_v50, %v4255_v24  ;;  %v1997_v39 = vmax.f32 %v1676_v49, 0.0  ;;  %v1999_v10 = vmax.f32 %v1869_v53, 0.0  ;;  %v4394_v24 = vld [vmem:[%s4444_s10] ss:$0 sm:$0xff]  ;;  %s3520_s10 = smov [#allocation7]  }
 0x301   :  { %s2719_s26 = sshll.u32 %s3520_s10, 4  ;;  %s2720_s26 = int_to_ptr.vmem [resolvable:$true] %s2719_s26 }
 0x302   :  { %v1998_v29 = vmax.f32 %v1678_v33, 0.0  ;;  %v2000_v34 = vmax.f32 %v1871_v19, 0.0  ;;  %v2061_v38 = vpack.c.bf16 %v1997_v39, %v1993_v35  ;;  %v2063_v55 = vpack.c.bf16 %v1999_v10, %v1995_v36  ;;  %s3487_s27 = scalar_lea.vmem %s2720_s26, 4096  ;;  %p3492_p11 = scmp.lt.s32.totalorder %s2720_s26, %s2720_s26 }
 0x303   :  { %p3488_p10 = scmp.ne.s32.totalorder %s2720_s26, %s3487_s27  ;;  %p3493_p12 = scmp.lt.s32.totalorder %s3487_s27, %s3487_s27 }
 0x304   :  { %v2062_v37 = vpack.c.bf16 %v1998_v29, %v1994_v26  ;;  %v2064_v27 = vpack.c.bf16 %v2000_v34, %v1996_v21 }
 0x305   :  { %p3494_p13 = por %p3493_p12, %p3492_p11 }
 0x306   :  { %2480 = vmatprep.mubr.bf16.mxu1 %v2062_v37  ;;  %2641 = vmatprep.mubr.bf16.mxu0 %v2064_v27 }
 0x307   :  { %2481 = vmatmul.mubr.bf16.gmra.mxu1 %v2061_v38  ;;  %2642 = vmatmul.mubr.bf16.gmra.mxu0 %v2063_v55  ;;  %p3495_p0 = pnand %p3494_p13, %p3488_p10 }
 0x34f   :  { %v2929_v51 = vpop.f32.mrf.mxu1  ;;  %v3041_v22 = vpop.f32.mrf.mxu0 }
 0x351   :  { %v2930_v44 = vpop.f32.mrf.mxu1  ;;  %v3042_v45 = vpop.f32.mrf.mxu0 }
 0x352   :  { %v2931_v30 = vadd.f32 %v2930_v44, %v2929_v51  ;;  %v3043_v56 = vadd.f32 %v3042_v45, %v3041_v22 }
 0x353   :  { %v2932_v42 = vpop.f32.mrf.mxu1  ;;  %v3044_v46 = vpop.f32.mrf.mxu0 }
 0x354   :  { %v2363_v7 = vadd.f32 %v2931_v30, %v4394_v24 }
 0x355   :  { %v2933_v23 = vpop.f32.mrf.mxu1  ;;  %v3045_v0 = vpop.f32.mrf.mxu0 }
 0x356   :  { %v2524_v1 = vadd.f32 %v3043_v56, %v2363_v7  ;;  %v2934_v3 = vadd.f32 %v2933_v23, %v2932_v42  ;;  %v3046_v63 = vadd.f32 %v3045_v0, %v3044_v46 }
 0x357   :  { %v2935_v31 = vpop.f32.mrf.mxu1  ;;  %v3047_v43 = vpop.f32.mrf.mxu0 }
 0x358   :  { %3383 = vtanh.f32 %v2524_v1  ;;  %v2366_v4 = vadd.f32 %v2934_v3, %v4394_v24 }
 0x359   :  { %v2936_v5 = vpop.f32.mrf.mxu1  ;;  %v3048_v48 = vpop.f32.mrf.mxu0 }
 0x35a   :  { %v2527_v52 = vadd.f32 %v3046_v63, %v2366_v4  ;;  %v2937_v58 = vadd.f32 %v2936_v5, %v2935_v31  ;;  %v3049_v9 = vadd.f32 %v3048_v48, %v3047_v43 }
 0x35b   :  { %v2938_v60 = vpop.f32.mrf.mxu1  ;;  %v3050_v6 = vpop.f32.mrf.mxu0 }
 0x35c   :  { %3385 = vtanh.f32 %v2527_v52  ;;  %v2371_v8 = vadd.f32 %v2937_v58, %v4394_v24 }
 0x35d   :  { %v2939_v32 = vpop.f32.mrf.mxu1  ;;  %v3051_v11 = vpop.f32.mrf.mxu0 }
 0x35e   :  { %v2532_v62 = vadd.f32 %v3049_v9, %v2371_v8  ;;  %v2940_v2 = vadd.f32 %v2939_v32, %v2938_v60  ;;  %v3052_v13 = vadd.f32 %v3051_v11, %v3050_v6 }
 0x35f   :  { %v2941_v57 = vpop.f32.mrf.mxu1  ;;  %v3053_v61 = vpop.f32.mrf.mxu0 }
 0x360   :  { %3387 = vtanh.f32 %v2532_v62  ;;  %v2374_v12 = vadd.f32 %v2940_v2, %v4394_v24 }
 0x361   :  { %v2942_v15 = vpop.f32.mrf.mxu1  ;;  %v3054_v18 = vpop.f32.mrf.mxu0 }
 0x362   :  { %v2535_v20 = vadd.f32 %v3052_v13, %v2374_v12  ;;  %v2943_v59 = vadd.f32 %v2942_v15, %v2941_v57  ;;  %v3055_v17 = vadd.f32 %v3054_v18, %v3053_v61 }
 0x363   :  { %v2944_v41 = vpop.f32.mrf.mxu1  ;;  %v3056_v16 = vpop.f32.mrf.mxu0 }
 0x364   :  { %3389 = vtanh.f32 %v2535_v20  ;;  %v2379_v28 = vadd.f32 %v2943_v59, %v4394_v24 }
 0x365   :  { %v3384_v25 = vpop.eup %3383  ;;  %v2945_v40 = vpop.f32.mrf.mxu1 }
 0x366   :  { %v3057_v49 = vpop.f32.mrf.mxu0  ;;  %2682 = vst [vmem:[#allocation7] sm:$0xff] %v3384_v25  ;;  %v2540_v53 = vadd.f32 %v3055_v17, %v2379_v28  ;;  %v2946_v14 = vadd.f32 %v2945_v40, %v2944_v41 }
 0x367   :  { %v2947_v47 = vpop.f32.mrf.mxu1  ;;  %v3058_v33 = vadd.f32 %v3057_v49, %v3056_v16 }
 0x368   :  { %v3059_v54 = vpop.f32.mrf.mxu0  ;;  %3391 = vtanh.f32 %v2540_v53  ;;  %v2382_v50 = vadd.f32 %v2946_v14, %v4394_v24 }
 0x369   :  { %v3386_v19 = vpop.eup %3385  ;;  %v2948_v39 = vpop.f32.mrf.mxu1 }
 0x36a   :  { %v3060_v10 = vpop.f32.mrf.mxu0  ;;  %2683 = vst [vmem:[#allocation7 + $0x8] sm:$0xff] %v3386_v19  ;;  %v2543_v26 = vadd.f32 %v3058_v33, %v2382_v50  ;;  %v2949_v21 = vadd.f32 %v2948_v39, %v2947_v47 }
 0x36b   :  { %v2950_v29 = vpop.f32.mrf.mxu1  ;;  %v3061_v36 = vadd.f32 %v3060_v10, %v3059_v54 }
 0x36c   :  { %v3062_v34 = vpop.f32.mrf.mxu0  ;;  %3393 = vtanh.f32 %v2543_v26  ;;  %v2387_v35 = vadd.f32 %v2949_v21, %v4394_v24 }
 0x36d   :  { %v3388_v37 = vpop.eup %3387  ;;  %v2951_v27 = vpop.f32.mrf.mxu1 }
 0x36e   :  { %v3063_v38 = vpop.f32.mrf.mxu0  ;;  %2684 = vst [vmem:[#allocation7 + $0x10] sm:$0xff] %v3388_v37  ;;  %v2548_v55 = vadd.f32 %v3061_v36, %v2387_v35  ;;  %v2952_v51 = vadd.f32 %v2951_v27, %v2950_v29 }
 0x36f   :  { %v2953_v22 = vpop.f32.mrf.mxu1  ;;  %v3064_v30 = vadd.f32 %v3063_v38, %v3062_v34 }
 0x370   :  { %v3065_v44 = vpop.f32.mrf.mxu0  ;;  %3395 = vtanh.f32 %v2548_v55  ;;  %v2390_v45 = vadd.f32 %v2952_v51, %v4394_v24 }
 0x371   :  { %v3390_v42 = vpop.eup %3389  ;;  %v2954_v46 = vpop.f32.mrf.mxu1 }
 0x372   :  { %v3066_v7 = vpop.f32.mrf.mxu0  ;;  %2685 = vst [vmem:[#allocation7 + $0x18] sm:$0xff] %v3390_v42  ;;  %v2551_v56 = vadd.f32 %v3064_v30, %v2390_v45  ;;  %v2955_v23 = vadd.f32 %v2954_v46, %v2953_v22 }
 0x373   :  { %v2956_v0 = vpop.f32.mrf.mxu1  ;;  %v3067_v31 = vadd.f32 %v3066_v7, %v3065_v44 }
 0x374   :  { %v3068_v1 = vpop.f32.mrf.mxu0  ;;  %3397 = vtanh.f32 %v2551_v56  ;;  %v2395_v3 = vadd.f32 %v2955_v23, %v4394_v24 }
 0x375   :  { %v3392_v43 = vpop.eup %3391  ;;  %v2957_v4 = vpop.f32.mrf.mxu1 }
 0x376   :  { %v3069_v63 = vpop.f32.mrf.mxu0  ;;  %2686 = vst [vmem:[#allocation7 + $0x20] sm:$0xff] %v3392_v43  ;;  %v2556_v5 = vadd.f32 %v3067_v31, %v2395_v3  ;;  %v2958_v48 = vadd.f32 %v2957_v4, %v2956_v0 }
 0x377   :  { %v2959_v52 = vpop.f32.mrf.mxu1  ;;  %v3070_v6 = vadd.f32 %v3069_v63, %v3068_v1 }
 0x378   :  { %v3071_v58 = vpop.f32.mrf.mxu0  ;;  %3399 = vtanh.f32 %v2556_v5  ;;  %v2398_v60 = vadd.f32 %v2958_v48, %v4394_v24 }
 0x379   :  { %v3394_v8 = vpop.eup %3393  ;;  %v2960_v9 = vpop.f32.mrf.mxu1 }
 0x37a   :  { %v3072_v32 = vpop.f32.mrf.mxu0  ;;  %2687 = vst [vmem:[#allocation7 + $0x28] sm:$0xff] %v3394_v8  ;;  %v2559_v11 = vadd.f32 %v3070_v6, %v2398_v60  ;;  %v2961_v62 = vadd.f32 %v2960_v9, %v2959_v52 }
 0x37b   :  { %v2962_v2 = vpop.f32.mrf.mxu1  ;;  %v3073_v12 = vadd.f32 %v3072_v32, %v3071_v58 }
 0x37c   :  { %v3074_v57 = vpop.f32.mrf.mxu0  ;;  %3401 = vtanh.f32 %v2559_v11  ;;  %v2403_v61 = vadd.f32 %v2961_v62, %v4394_v24 }
 0x37d   :  { %v3396_v13 = vpop.eup %3395  ;;  %v2963_v15 = vpop.f32.mrf.mxu1 }
 0x37e   :  { %v3075_v18 = vpop.f32.mrf.mxu0  ;;  %2688 = vst [vmem:[#allocation7 + $0x30] sm:$0xff] %v3396_v13  ;;  %v2564_v20 = vadd.f32 %v3073_v12, %v2403_v61  ;;  %v2964_v59 = vadd.f32 %v2963_v15, %v2962_v2 }
 0x37f   :  { %v2965_v41 = vpop.f32.mrf.mxu1  ;;  %v3076_v17 = vadd.f32 %v3075_v18, %v3074_v57 }
 0x380   :  { %v3077_v16 = vpop.f32.mrf.mxu0  ;;  %3403 = vtanh.f32 %v2564_v20  ;;  %v2406_v28 = vadd.f32 %v2964_v59, %v4394_v24 }
 0x381   :  { %v3398_v25 = vpop.eup %3397  ;;  %v2966_v40 = vpop.f32.mrf.mxu1 }
 0x382   :  { %v3078_v49 = vpop.f32.mrf.mxu0  ;;  %2689 = vst [vmem:[#allocation7 + $0x38] sm:$0xff] %v3398_v25  ;;  %v2567_v53 = vadd.f32 %v3076_v17, %v2406_v28  ;;  %v2967_v14 = vadd.f32 %v2966_v40, %v2965_v41 }
 0x383   :  { %v2968_v47 = vpop.f32.mrf.mxu1  ;;  %v3079_v33 = vadd.f32 %v3078_v49, %v3077_v16 }
 0x384   :  { %v3080_v54 = vpop.f32.mrf.mxu0  ;;  %3405 = vtanh.f32 %v2567_v53  ;;  %v2411_v50 = vadd.f32 %v2967_v14, %v4394_v24 }
 0x385   :  { %v3400_v19 = vpop.eup %3399  ;;  %v2969_v39 = vpop.f32.mrf.mxu1 }
 0x386   :  { %v3081_v10 = vpop.f32.mrf.mxu0  ;;  %2690 = vst [vmem:[#allocation7 + $0x40] sm:$0xff] %v3400_v19  ;;  %v2572_v26 = vadd.f32 %v3079_v33, %v2411_v50  ;;  %v2970_v21 = vadd.f32 %v2969_v39, %v2968_v47 }
 0x387   :  { %v2971_v29 = vpop.f32.mrf.mxu1  ;;  %v3082_v36 = vadd.f32 %v3081_v10, %v3080_v54 }
 0x388   :  { %v3083_v34 = vpop.f32.mrf.mxu0  ;;  %3407 = vtanh.f32 %v2572_v26  ;;  %v2414_v35 = vadd.f32 %v2970_v21, %v4394_v24 }
 0x389   :  { %v3402_v37 = vpop.eup %3401  ;;  %v2972_v27 = vpop.f32.mrf.mxu1 }
 0x38a   :  { %v3084_v38 = vpop.f32.mrf.mxu0  ;;  %2691 = vst [vmem:[#allocation7 + $0x48] sm:$0xff] %v3402_v37  ;;  %v2575_v55 = vadd.f32 %v3082_v36, %v2414_v35  ;;  %v2973_v51 = vadd.f32 %v2972_v27, %v2971_v29 }
 0x38b   :  { %v2974_v22 = vpop.f32.mrf.mxu1  ;;  %v3085_v30 = vadd.f32 %v3084_v38, %v3083_v34 }
 0x38c   :  { %v3086_v44 = vpop.f32.mrf.mxu0  ;;  %3409 = vtanh.f32 %v2575_v55  ;;  %v2419_v45 = vadd.f32 %v2973_v51, %v4394_v24 }
 0x38d   :  { %v3404_v42 = vpop.eup %3403  ;;  %v2975_v46 = vpop.f32.mrf.mxu1 }
 0x38e   :  { %v3087_v7 = vpop.f32.mrf.mxu0  ;;  %2692 = vst [vmem:[#allocation7 + $0x50] sm:$0xff] %v3404_v42  ;;  %v2580_v56 = vadd.f32 %v3085_v30, %v2419_v45  ;;  %v2976_v23 = vadd.f32 %v2975_v46, %v2974_v22 }
 0x38f   :  { %v2977_v0 = vpop.f32.mrf.mxu1  ;;  %v3088_v31 = vadd.f32 %v3087_v7, %v3086_v44 }
 0x390   :  { %v3089_v1 = vpop.f32.mrf.mxu0  ;;  %3411 = vtanh.f32 %v2580_v56  ;;  %v2422_v3 = vadd.f32 %v2976_v23, %v4394_v24 }
 0x391   :  { %v3406_v43 = vpop.eup %3405  ;;  %v2978_v4 = vpop.f32.mrf.mxu1 }
 0x392   :  { %v3090_v63 = vpop.f32.mrf.mxu0  ;;  %2693 = vst [vmem:[#allocation7 + $0x58] sm:$0xff] %v3406_v43  ;;  %v2583_v5 = vadd.f32 %v3088_v31, %v2422_v3  ;;  %v2979_v48 = vadd.f32 %v2978_v4, %v2977_v0 }
 0x393   :  { %v2980_v52 = vpop.f32.mrf.mxu1  ;;  %v3091_v6 = vadd.f32 %v3090_v63, %v3089_v1 }
 0x394   :  { %v3092_v58 = vpop.f32.mrf.mxu0  ;;  %3413 = vtanh.f32 %v2583_v5  ;;  %v2427_v60 = vadd.f32 %v2979_v48, %v4394_v24 }
 0x395   :  { %v3408_v8 = vpop.eup %3407  ;;  %v2981_v9 = vpop.f32.mrf.mxu1 }
 0x396   :  { %v3093_v32 = vpop.f32.mrf.mxu0  ;;  %2694 = vst [vmem:[#allocation7 + $0x60] sm:$0xff] %v3408_v8  ;;  %v2588_v11 = vadd.f32 %v3091_v6, %v2427_v60  ;;  %v2982_v62 = vadd.f32 %v2981_v9, %v2980_v52 }
 0x397   :  { %v2983_v2 = vpop.f32.mrf.mxu1  ;;  %v3094_v12 = vadd.f32 %v3093_v32, %v3092_v58 }
 0x398   :  { %v3095_v57 = vpop.f32.mrf.mxu0  ;;  %3415 = vtanh.f32 %v2588_v11  ;;  %v2430_v61 = vadd.f32 %v2982_v62, %v4394_v24 }
 0x399   :  { %v3410_v13 = vpop.eup %3409  ;;  %v2984_v15 = vpop.f32.mrf.mxu1 }
 0x39a   :  { %v3096_v18 = vpop.f32.mrf.mxu0  ;;  %2695 = vst [vmem:[#allocation7 + $0x68] sm:$0xff] %v3410_v13  ;;  %v2591_v20 = vadd.f32 %v3094_v12, %v2430_v61  ;;  %v2985_v59 = vadd.f32 %v2984_v15, %v2983_v2 }
 0x39b   :  { %v2986_v41 = vpop.f32.mrf.mxu1  ;;  %v3097_v17 = vadd.f32 %v3096_v18, %v3095_v57 }
 0x39c   :  { %v3098_v16 = vpop.f32.mrf.mxu0  ;;  %3417 = vtanh.f32 %v2591_v20  ;;  %v2435_v28 = vadd.f32 %v2985_v59, %v4394_v24 }
 0x39d   :  { %v3412_v25 = vpop.eup %3411  ;;  %v2987_v40 = vpop.f32.mrf.mxu1 }
 0x39e   :  { %v3099_v49 = vpop.f32.mrf.mxu0  ;;  %2696 = vst [vmem:[#allocation7 + $0x70] sm:$0xff] %v3412_v25  ;;  %v2596_v53 = vadd.f32 %v3097_v17, %v2435_v28  ;;  %v2988_v14 = vadd.f32 %v2987_v40, %v2986_v41 }
 0x39f   :  { %v2989_v47 = vpop.f32.mrf.mxu1  ;;  %v3100_v33 = vadd.f32 %v3099_v49, %v3098_v16 }
 0x3a0   :  { %v3101_v54 = vpop.f32.mrf.mxu0  ;;  %3419 = vtanh.f32 %v2596_v53  ;;  %v2438_v50 = vadd.f32 %v2988_v14, %v4394_v24 }
 0x3a1   :  { %v3414_v19 = vpop.eup %3413  ;;  %v2990_v39 = vpop.f32.mrf.mxu1 }
 0x3a2   :  { %v3102_v10 = vpop.f32.mrf.mxu0  ;;  %2697 = vst [vmem:[#allocation7 + $0x78] sm:$0xff] %v3414_v19  ;;  %v2599_v26 = vadd.f32 %v3100_v33, %v2438_v50  ;;  %v2991_v21 = vadd.f32 %v2990_v39, %v2989_v47 }
 0x3a3   :  { %v2992_v29 = vpop.f32.mrf.mxu1  ;;  %v3103_v36 = vadd.f32 %v3102_v10, %v3101_v54 }
 0x3a4   :  { %v3104_v34 = vpop.f32.mrf.mxu0  ;;  %3421 = vtanh.f32 %v2599_v26  ;;  %v2443_v35 = vadd.f32 %v2991_v21, %v4394_v24 }
 0x3a5   :  { %v3416_v37 = vpop.eup %3415  ;;  %v2993_v27 = vpop.f32.mrf.mxu1 }
 0x3a6   :  { %v3105_v38 = vpop.f32.mrf.mxu0  ;;  %2698 = vst [vmem:[#allocation7 + $0x80] sm:$0xff] %v3416_v37  ;;  %v2604_v55 = vadd.f32 %v3103_v36, %v2443_v35  ;;  %v2994_v51 = vadd.f32 %v2993_v27, %v2992_v29 }
 0x3a7   :  { %v2995_v22 = vpop.f32.mrf.mxu1  ;;  %v3106_v30 = vadd.f32 %v3105_v38, %v3104_v34 }
 0x3a8   :  { %v3107_v44 = vpop.f32.mrf.mxu0  ;;  %3423 = vtanh.f32 %v2604_v55  ;;  %v2446_v45 = vadd.f32 %v2994_v51, %v4394_v24 }
 0x3a9   :  { %v3418_v42 = vpop.eup %3417  ;;  %v2996_v46 = vpop.f32.mrf.mxu1 }
 0x3aa   :  { %v3108_v7 = vpop.f32.mrf.mxu0  ;;  %2699 = vst [vmem:[#allocation7 + $0x88] sm:$0xff] %v3418_v42  ;;  %v2607_v56 = vadd.f32 %v3106_v30, %v2446_v45  ;;  %v2997_v23 = vadd.f32 %v2996_v46, %v2995_v22 }
 0x3ab   :  { %v2998_v0 = vpop.f32.mrf.mxu1  ;;  %v3109_v31 = vadd.f32 %v3108_v7, %v3107_v44 }
 0x3ac   :  { %v3110_v1 = vpop.f32.mrf.mxu0  ;;  %3425 = vtanh.f32 %v2607_v56  ;;  %v2451_v3 = vadd.f32 %v2997_v23, %v4394_v24 }
 0x3ad   :  { %v3420_v43 = vpop.eup %3419  ;;  %v2999_v4 = vpop.f32.mrf.mxu1 }
 0x3ae   :  { %v3111_v63 = vpop.f32.mrf.mxu0  ;;  %2700 = vst [vmem:[#allocation7 + $0x90] sm:$0xff] %v3420_v43  ;;  %v2612_v5 = vadd.f32 %v3109_v31, %v2451_v3  ;;  %v3000_v48 = vadd.f32 %v2999_v4, %v2998_v0 }
 0x3af   :  { %v3001_v52 = vpop.f32.mrf.mxu1  ;;  %v3112_v6 = vadd.f32 %v3111_v63, %v3110_v1 }
 0x3b0   :  { %v3113_v58 = vpop.f32.mrf.mxu0  ;;  %3427 = vtanh.f32 %v2612_v5  ;;  %v2454_v60 = vadd.f32 %v3000_v48, %v4394_v24 }
 0x3b1   :  { %v3422_v8 = vpop.eup %3421  ;;  %v3002_v9 = vpop.f32.mrf.mxu1 }
 0x3b2   :  { %v3114_v32 = vpop.f32.mrf.mxu0  ;;  %2701 = vst [vmem:[#allocation7 + $0x98] sm:$0xff] %v3422_v8  ;;  %v2615_v11 = vadd.f32 %v3112_v6, %v2454_v60  ;;  %v3003_v62 = vadd.f32 %v3002_v9, %v3001_v52 }
 0x3b3   :  { %v3004_v2 = vpop.f32.mrf.mxu1  ;;  %v3115_v12 = vadd.f32 %v3114_v32, %v3113_v58 }
 0x3b4   :  { %v3116_v57 = vpop.f32.mrf.mxu0  ;;  %3429 = vtanh.f32 %v2615_v11  ;;  %v2459_v61 = vadd.f32 %v3003_v62, %v4394_v24 }
 0x3b5   :  { %v3424_v13 = vpop.eup %3423  ;;  %v3005_v15 = vpop.f32.mrf.mxu1 }
 0x3b6   :  { %v3117_v18 = vpop.f32.mrf.mxu0  ;;  %2702 = vst [vmem:[#allocation7 + $0xa0] sm:$0xff] %v3424_v13  ;;  %v2620_v20 = vadd.f32 %v3115_v12, %v2459_v61  ;;  %v3006_v59 = vadd.f32 %v3005_v15, %v3004_v2 }
 0x3b7   :  { %v3007_v41 = vpop.f32.mrf.mxu1  ;;  %v3118_v17 = vadd.f32 %v3117_v18, %v3116_v57 }
 0x3b8   :  { %v3119_v16 = vpop.f32.mrf.mxu0  ;;  %3431 = vtanh.f32 %v2620_v20  ;;  %v2462_v28 = vadd.f32 %v3006_v59, %v4394_v24 }
 0x3b9   :  { %v3426_v25 = vpop.eup %3425  ;;  %v3008_v40 = vpop.f32.mrf.mxu1 }
 0x3ba   :  { %v3120_v49 = vpop.f32.mrf.mxu0  ;;  %2703 = vst [vmem:[#allocation7 + $0xa8] sm:$0xff] %v3426_v25  ;;  %v2623_v53 = vadd.f32 %v3118_v17, %v2462_v28  ;;  %v3009_v14 = vadd.f32 %v3008_v40, %v3007_v41 }
 0x3bb   :  { %v3010_v47 = vpop.f32.mrf.mxu1  ;;  %v3121_v33 = vadd.f32 %v3120_v49, %v3119_v16 }
 0x3bc   :  { %v3122_v54 = vpop.f32.mrf.mxu0  ;;  %3433 = vtanh.f32 %v2623_v53  ;;  %v2467_v50 = vadd.f32 %v3009_v14, %v4394_v24 }
 0x3bd   :  { %v3428_v19 = vpop.eup %3427  ;;  %v3011_v39 = vpop.f32.mrf.mxu1 }
 0x3be   :  { %v3123_v10 = vpop.f32.mrf.mxu0  ;;  %2704 = vst [vmem:[#allocation7 + $0xb0] sm:$0xff] %v3428_v19  ;;  %v2628_v26 = vadd.f32 %v3121_v33, %v2467_v50  ;;  %v3012_v21 = vadd.f32 %v3011_v39, %v3010_v47 }
 0x3bf   :  { %v3013_v29 = vpop.f32.mrf.mxu1  ;;  %v3124_v36 = vadd.f32 %v3123_v10, %v3122_v54 }
 0x3c0   :  { %v3125_v34 = vpop.f32.mrf.mxu0  ;;  %3435 = vtanh.f32 %v2628_v26  ;;  %v2470_v35 = vadd.f32 %v3012_v21, %v4394_v24 }
 0x3c1   :  { %v3430_v37 = vpop.eup %3429  ;;  %v3014_v27 = vpop.f32.mrf.mxu1 }
 0x3c2   :  { %v3126_v38 = vpop.f32.mrf.mxu0  ;;  %2705 = vst [vmem:[#allocation7 + $0xb8] sm:$0xff] %v3430_v37  ;;  %v2631_v55 = vadd.f32 %v3124_v36, %v2470_v35  ;;  %v3015_v51 = vadd.f32 %v3014_v27, %v3013_v29 }
 0x3c3   :  { %v3016_v22 = vpop.f32.mrf.mxu1  ;;  %v3127_v30 = vadd.f32 %v3126_v38, %v3125_v34 }
 0x3c4   :  { %v3128_v44 = vpop.f32.mrf.mxu0  ;;  %3437 = vtanh.f32 %v2631_v55  ;;  %v2475_v45 = vadd.f32 %v3015_v51, %v4394_v24 }
 0x3c5   :  { %v3432_v42 = vpop.eup %3431  ;;  %v3017_v46 = vpop.f32.mrf.mxu1 }
 0x3c6   :  { %v3129_v7 = vpop.f32.mrf.mxu0  ;;  %2706 = vst [vmem:[#allocation7 + $0xc0] sm:$0xff] %v3432_v42  ;;  %v2636_v56 = vadd.f32 %v3127_v30, %v2475_v45  ;;  %v3018_v23 = vadd.f32 %v3017_v46, %v3016_v22 }
 0x3c7   :  { %v3019_v0 = vpop.f32.mrf.mxu1  ;;  %v3130_v31 = vadd.f32 %v3129_v7, %v3128_v44 }
 0x3c8   :  { %v3131_v1 = vpop.f32.mrf.mxu0  ;;  %3439 = vtanh.f32 %v2636_v56  ;;  %v2478_v3 = vadd.f32 %v3018_v23, %v4394_v24 }
 0x3c9   :  { %v3434_v43 = vpop.eup %3433  ;;  %v3020_v4 = vpop.f32.mrf.mxu1 }
 0x3ca   :  { %v3132_v63 = vpop.f32.mrf.mxu0  ;;  %2707 = vst [vmem:[#allocation7 + $0xc8] sm:$0xff] %v3434_v43  ;;  %v2639_v5 = vadd.f32 %v3130_v31, %v2478_v3  ;;  %v3021_v48 = vadd.f32 %v3020_v4, %v3019_v0 }
 0x3cb   :  { %v3022_v52 = vpop.f32.mrf.mxu1  ;;  %v3133_v6 = vadd.f32 %v3132_v63, %v3131_v1 }
 0x3cc   :  { %v3134_v58 = vpop.f32.mrf.mxu0  ;;  %3441 = vtanh.f32 %v2639_v5  ;;  %v2483_v60 = vadd.f32 %v3021_v48, %v4394_v24 }
 0x3cd   :  { %v3436_v8 = vpop.eup %3435  ;;  %v3023_v9 = vpop.f32.mrf.mxu1 }
 0x3ce   :  { %v3135_v32 = vpop.f32.mrf.mxu0  ;;  %2708 = vst [vmem:[#allocation7 + $0xd0] sm:$0xff] %v3436_v8  ;;  %v2644_v11 = vadd.f32 %v3133_v6, %v2483_v60  ;;  %v3024_v62 = vadd.f32 %v3023_v9, %v3022_v52 }
 0x3cf   :  { %v3136_v57 = vadd.f32 %v3135_v32, %v3134_v58 }
 0x3d0   :  { %3443 = vtanh.f32 %v2644_v11  ;;  %v2486_v2 = vadd.f32 %v3024_v62, %v4394_v24 }
 0x3d1   :  { %v3438_v61 = vpop.eup %3437 }
 0x3d2   :  { %2709 = vst [vmem:[#allocation7 + $0xd8] sm:$0xff] %v3438_v61  ;;  %v2647_v12 = vadd.f32 %v3136_v57, %v2486_v2 }
 0x3d4   :  { %3445 = vtanh.f32 %v2647_v12 }
 0x3d5   :  { %v3440_v13 = vpop.eup %3439 }
 0x3d6   :  { %2710 = vst [vmem:[#allocation7 + $0xe0] sm:$0xff] %v3440_v13 }
 0x3d9   :  { %v3442_v15 = vpop.eup %3441 }
 0x3da   :  { %2711 = vst [vmem:[#allocation7 + $0xe8] sm:$0xff] %v3442_v15 }
 0x3dd   :  { %v3444_v18 = vpop.eup %3443 }
 0x3de   :  { %2712 = vst [vmem:[#allocation7 + $0xf0] sm:$0xff] %v3444_v18 }
 0x3e1   :  { %v3446_v20 = vpop.eup %3445 }
 0x3e2   :  { %2713 = vst [vmem:[#allocation7 + $0xf8] sm:$0xff] %v3446_v20 }
 0x3e3   :  { %3498 = shalt.err (!%p3495_p0)
}
 0x3e4   :  { %2725 = dma.vmem_to_hbm [thread:$0]  %s2720_s26, 4096, %s4445_s11, [#allocation4], %s3514_s20, %s3514_s20, %s3515_s21  }
 0x3e5   :  { %3511 = dma.done.wait [#allocation4], 4096  }
 0x3e6   :  { %3512 = vsyncadd [#allocation4], 4294963200 }
 0x3e7   :  { %2729 = vsyncpa [#allocation3], 1 }
 0x3e8   :  { %2730 = vsyncpa [#allocation6], 1 }
 0x3e9   :  { %2731 = vsyncpa [#allocation4], 1 }

</bundles_post_ra>
